<compile_context>
chip_gen: v7x
topology: tpu7x:2x2x1
jax: 0.10.0
libtpu: 0.0.40
codegen_flags: <defaults>
</compile_context>

<pallas_src>
import functools
import math

import jax
import jax.numpy as jnp
from jax import lax
from jax.experimental import pallas as pl
from jax.experimental.pallas import tpu as pltpu


def _routed_attn_kernel(num_heads, head_dim, scale, causal, has_pad,
                        routes_ref,          # SMEM (B,) int32 (scalar prefetch)
                        x_ref, wq_ref, wk_ref, wv_ref, wo_ref,
                        cos_ref, sin_ref, pad_ref,
                        o_ref,
                        attn_scratch):       # VMEM (L, D) bf16
    del routes_ref  # consumed only by the BlockSpec index_maps
    L = x_ref.shape[1]
    D = x_ref.shape[2]

    x = x_ref[0]                                   # (L, D) bf16
    wq = wq_ref[0]                                 # (D, D) bf16 routed slab
    wk = wk_ref[0]
    wv = wv_ref[0]
    wo = wo_ref[0]

    # QKV projections: bf16 operands on the MXU, f32 accumulation.
    # Softmax scale is folded into q here (linear, commutes with RoPE).
    q = jnp.dot(x, wq, preferred_element_type=jnp.float32) * scale
    k = jnp.dot(x, wk, preferred_element_type=jnp.float32)
    v = jnp.dot(x, wv, preferred_element_type=jnp.float32)

    # Interleaved RoPE. Tables arrive as (L, head_dim) and are tiled across
    # heads in-kernel (lane concat). The pair swap (x0,x1)->(x1,x0) is a lane
    # swizzle: select between +1 / -1 lane-rolled copies by lane parity
    # (jnp.roll lowers to static lane slices + concat; no MXU involved).
    cos = jnp.concatenate([cos_ref[...]] * num_heads, axis=-1)       # (L, D)
    sin = jnp.concatenate([sin_ref[...]] * num_heads, axis=-1)       # signed
    lane = lax.broadcasted_iota(jnp.int32, (L, D), 1)
    is_even = (lane % 2) == 0

    def _rope(t):
        fwd = jnp.roll(t, -1, axis=1)    # fwd[:, j] = t[:, j+1]
        bwd = jnp.roll(t, 1, axis=1)     # bwd[:, j] = t[:, j-1]
        swapped = jnp.where(is_even, fwd, bwd)  # wrapped lanes never selected
        return t * cos + swapped * sin

    q = _rope(q)
    k = _rope(k)

    # Attention keep-mask, generated in-kernel (True = attend, SDPA bool
    # semantics). Faithful to the reference: triu(k=1) == strictly-future,
    # OR-combined with the key-padding keep mask when provided.
    keep = None
    if causal or has_pad:
        row = lax.broadcasted_iota(jnp.int32, (L, L), 0)
        col = lax.broadcasted_iota(jnp.int32, (L, L), 1)
        if causal:
            keep = col > row
            if has_pad:
                keep = keep | (pad_ref[0] > 0.5)
        else:
            keep = jnp.broadcast_to(pad_ref[0] > 0.5, (L, L))

    # Per-head attention; outputs written straight into the (L, D) VMEM slab.
    for h in range(num_heads):               # static, fully unrolled
        sl = slice(h * head_dim, (h + 1) * head_dim)
        qh = q[:, sl].astype(jnp.bfloat16)
        kh = k[:, sl].astype(jnp.bfloat16)
        vh = v[:, sl].astype(jnp.bfloat16)
        s = lax.dot_general(qh, kh, (((1,), (1,)), ((), ())),
                            preferred_element_type=jnp.float32)      # (L, L)
        if keep is not None:
            s = jnp.where(keep, s, -jnp.inf)
        m = jnp.max(s, axis=-1, keepdims=True)
        p = jnp.exp(s - m)
        denom = jnp.sum(p, axis=-1, keepdims=True)
        p = p * pl.reciprocal(denom, approx=True)
        head_out = jnp.dot(p.astype(jnp.bfloat16), vh,
                           preferred_element_type=jnp.float32)
        attn_scratch[:, sl] = head_out.astype(jnp.bfloat16)

    # Output projection on the full (L, D) slab (full-K matmul on the MXU).
    o_ref[0] = jnp.dot(attn_scratch[...], wo,
                       preferred_element_type=jnp.float32)


def routed_self_attention(x, params, causal=True, key_padding_mask=None):
    B, L, D = x.shape
    num_heads = params["num_heads"]
    head_dim = D // num_heads
    assert head_dim * num_heads == D
    scale = head_dim ** (-0.5)

    # ---- router (glue: O(B*D*A), needed ahead of time for scalar prefetch) ----
    pooled = jnp.mean(x, axis=1)                                      # (B, D)
    logits = pooled @ params["router_w"].T + params["router_b"]       # (B, A)
    attn_probs = jax.nn.softmax(logits, axis=-1)
    routes = jnp.argmax(attn_probs, axis=-1).astype(jnp.int32)        # (B,)

    # ---- group batches by route so consecutive grid steps reuse the same ----
    # ---- routed weight block (Pallas skips the 4x(D,D) DMA on repeats)  ----
    order = jnp.argsort(routes)
    inv_order = jnp.argsort(order)
    routes_sorted = routes[order]
    x_sorted = x[order].astype(jnp.bfloat16)

    # ---- RoPE tables at (L, head_dim): interleaved pairs, base 10000 ----
    half = head_dim // 2
    inv_freq = 1.0 / (10000.0 ** (jnp.arange(half, dtype=jnp.float32)
                                  * 2.0 / head_dim))
    pos = jnp.arange(L, dtype=jnp.float32)
    ang = pos[:, None] * inv_freq[None, :]                            # (L, half)
    cos_hd = jnp.repeat(jnp.cos(ang), 2, axis=-1)                     # (L, hd)
    sin_hd = jnp.repeat(jnp.sin(ang), 2, axis=-1)
    sign = jnp.tile(jnp.array([-1.0, 1.0], jnp.float32), half)
    sin_hd = sin_hd * sign[None, :]                                   # signed sin

    # ---- key-padding keep mask as a tiny (B, 1, L) vector (True = attend) ----
    has_pad = key_padding_mask is not None
    if has_pad:
        pad_keep = key_padding_mask[order].astype(jnp.float32)[:, None, :]
    else:
        pad_keep = jnp.zeros((B, 1, L), jnp.float32)   # unused (has_pad=False)

    wq = params["query_projs"].astype(jnp.bfloat16)
    wk = params["key_projs"].astype(jnp.bfloat16)
    wv = params["value_projs"].astype(jnp.bfloat16)
    wo = params["out_projs"].astype(jnp.bfloat16)

    kernel = functools.partial(_routed_attn_kernel, num_heads, head_dim, scale,
                               bool(causal), bool(has_pad))

    out_sorted = pl.pallas_call(
        kernel,
        out_shape=jax.ShapeDtypeStruct((B, L, D), jnp.float32),
        grid_spec=pltpu.PrefetchScalarGridSpec(
            num_scalar_prefetch=1,
            grid=(B,),
            in_specs=[
                pl.BlockSpec((1, L, D), lambda b, r: (b, 0, 0)),        # x (bf16)
                pl.BlockSpec((1, D, D), lambda b, r: (r[b], 0, 0)),     # Wq (routed)
                pl.BlockSpec((1, D, D), lambda b, r: (r[b], 0, 0)),     # Wk
                pl.BlockSpec((1, D, D), lambda b, r: (r[b], 0, 0)),     # Wv
                pl.BlockSpec((1, D, D), lambda b, r: (r[b], 0, 0)),     # Wo
                pl.BlockSpec((L, head_dim), lambda b, r: (0, 0)),       # cos (L, hd)
                pl.BlockSpec((L, head_dim), lambda b, r: (0, 0)),       # signed sin
                pl.BlockSpec((1, 1, L), lambda b, r: (b, 0, 0)),        # pad keep
            ],
            out_specs=pl.BlockSpec((1, L, D), lambda b, r: (b, 0, 0)),
            scratch_shapes=[pltpu.VMEM((L, D), jnp.bfloat16)],
        ),
        compiler_params=pltpu.CompilerParams(
            dimension_semantics=("parallel",),            # batch axis independent
            vmem_limit_bytes=64 * 1024 * 1024,
        ),
    )(routes_sorted, x_sorted, wq, wk, wv, wo, cos_hd, sin_hd, pad_keep)

    out = out_sorted[inv_order]                           # undo route grouping
    return out, attn_probs


def init_params(key, dim, num_attentions, num_heads):
    ks = jax.random.split(key, 6)
    shape = (num_attentions, dim, dim)
    bound = 1.0 / math.sqrt(dim)
    return dict(
        num_heads=num_heads,
        # Routed projection slabs stored in bf16: halves the dominant per-batch
        # weight DMA and VMEM footprint; MXU accumulates in f32 in the kernel.
        query_projs=jax.random.normal(ks[0], shape, jnp.float32).astype(jnp.bfloat16),
        key_projs=jax.random.normal(ks[1], shape, jnp.float32).astype(jnp.bfloat16),
        value_projs=jax.random.normal(ks[2], shape, jnp.float32).astype(jnp.bfloat16),
        out_projs=jax.random.normal(ks[3], shape, jnp.float32).astype(jnp.bfloat16),
        # nn.Linear default init ~ U(-1/sqrt(dim), 1/sqrt(dim))
        router_w=jax.random.uniform(ks[4], (num_attentions, dim), jnp.float32,
                                    -bound, bound),
        router_b=jax.random.uniform(ks[5], (num_attentions,), jnp.float32,
                                    -bound, bound),
    )


if __name__ == "__main__":
    key = jax.random.PRNGKey(0)
    B, L, D = 2, 8, 32
    num_heads, num_attentions = 4, 3

    kx, kp = jax.random.split(key)
    x = jax.random.normal(kx, (B, L, D), jnp.float32)
    params = init_params(kp, D, num_attentions, num_heads)

    # Default path (causal=True). NOTE: per the reference module's SDPA
    # bool-mask usage this attends only to strictly-future keys and the last
    # query row is fully masked (NaN) — reproduced faithfully.
    out, probs = routed_self_attention(x, params, causal=True)
    jax.block_until_ready(out)
    jax.block_until_ready(probs)

    # Unmasked path (finite everywhere).
    out2, _ = routed_self_attention(x, params, causal=False)
    jax.block_until_ready(out2)

    # Causal + key-padding path (keep first L-2 keys).
    kpm = jnp.broadcast_to(jnp.arange(L)[None, :] < (L - 2), (B, L))
    out3, _ = routed_self_attention(x, params, causal=True, key_padding_mask=kpm)
    jax.block_until_ready(out3)

    print("KERNEL_OK")
</pallas_src>

<mosaic_0001>
module attributes {stable_mosaic.version = 11 : i64} {
  func.func @_routed_attn_kernel(%arg0: i32, %arg1: memref<2xi32, #tpu.memory_space<smem>>, %arg2: memref<1x8x32xbf16, #tpu.memory_space<vmem>>, %arg3: memref<1x32x32xbf16, #tpu.memory_space<vmem>>, %arg4: memref<1x32x32xbf16, #tpu.memory_space<vmem>>, %arg5: memref<1x32x32xbf16, #tpu.memory_space<vmem>>, %arg6: memref<1x32x32xbf16, #tpu.memory_space<vmem>>, %arg7: memref<8x8xf32, #tpu.memory_space<vmem>>, %arg8: memref<8x8xf32, #tpu.memory_space<vmem>>, %arg9: memref<1x1x8xf32, #tpu.memory_space<vmem>>, %arg10: memref<1x8x32xf32, #tpu.memory_space<vmem>>, %arg11: memref<8x32xbf16, #tpu.memory_space<vmem>>) attributes {dimension_semantics = [#tpu.dimension_semantics<parallel>], iteration_bounds = array<i64: 2>, scalar_prefetch = 1 : i64, scratch_operands = 1 : i64, tpu.core_type = #tpu.core_type<tc>, window_params = [{transform_indices = @transform_0, window_bounds = array<i64: 1, 8, 32>}, {transform_indices = @transform_1, window_bounds = array<i64: 1, 32, 32>}, {transform_indices = @transform_2, window_bounds = array<i64: 1, 32, 32>}, {transform_indices = @transform_3, window_bounds = array<i64: 1, 32, 32>}, {transform_indices = @transform_4, window_bounds = array<i64: 1, 32, 32>}, {pipeline_mode = #tpu.pipeline_mode<synchronous>, transform_indices = @transform_5, window_bounds = array<i64: 8, 8>}, {pipeline_mode = #tpu.pipeline_mode<synchronous>, transform_indices = @transform_6, window_bounds = array<i64: 8, 8>}, {transform_indices = @transform_7, window_bounds = array<i64: 1, 1, 8>}, {transform_indices = @transform_8, window_bounds = array<i64: 1, 8, 32>}]} {
    %c0 = arith.constant 0 : index
    %c0_0 = arith.constant 0 : index
    %c0_1 = arith.constant 0 : index
    %0 = vector.load %arg2[%c0, %c0_0, %c0_1] : memref<1x8x32xbf16, #tpu.memory_space<vmem>>, vector<1x8x32xbf16>
    %1 = vector.shape_cast %0 : vector<1x8x32xbf16> to vector<8x32xbf16>
    %c0_2 = arith.constant 0 : index
    %c0_3 = arith.constant 0 : index
    %c0_4 = arith.constant 0 : index
    %2 = vector.load %arg3[%c0_2, %c0_3, %c0_4] : memref<1x32x32xbf16, #tpu.memory_space<vmem>>, vector<1x32x32xbf16>
    %3 = vector.shape_cast %2 : vector<1x32x32xbf16> to vector<32x32xbf16>
    %c0_5 = arith.constant 0 : index
    %c0_6 = arith.constant 0 : index
    %c0_7 = arith.constant 0 : index
    %4 = vector.load %arg4[%c0_5, %c0_6, %c0_7] : memref<1x32x32xbf16, #tpu.memory_space<vmem>>, vector<1x32x32xbf16>
    %5 = vector.shape_cast %4 : vector<1x32x32xbf16> to vector<32x32xbf16>
    %c0_8 = arith.constant 0 : index
    %c0_9 = arith.constant 0 : index
    %c0_10 = arith.constant 0 : index
    %6 = vector.load %arg5[%c0_8, %c0_9, %c0_10] : memref<1x32x32xbf16, #tpu.memory_space<vmem>>, vector<1x32x32xbf16>
    %7 = vector.shape_cast %6 : vector<1x32x32xbf16> to vector<32x32xbf16>
    %c0_11 = arith.constant 0 : index
    %c0_12 = arith.constant 0 : index
    %c0_13 = arith.constant 0 : index
    %8 = vector.load %arg6[%c0_11, %c0_12, %c0_13] : memref<1x32x32xbf16, #tpu.memory_space<vmem>>, vector<1x32x32xbf16>
    %9 = vector.shape_cast %8 : vector<1x32x32xbf16> to vector<32x32xbf16>
    %cst = arith.constant dense<0.000000e+00> : vector<8x32xf32>
    %10 = tpu.matmul %1, %3, %cst {dimension_numbers = #tpu.dot_dimension_numbers<[1], [0], [0], [1], [0, 0, 1, 1], [], []>} : vector<8x32xbf16>, vector<32x32xbf16>, vector<8x32xf32> -> vector<8x32xf32>
    %cst_14 = arith.constant 0.353553385 : f32
    %11 = vector.broadcast %cst_14 : f32 to vector<8x32xf32>
    %12 = arith.mulf %10, %11 : vector<8x32xf32>
    %cst_15 = arith.constant dense<0.000000e+00> : vector<8x32xf32>
    %13 = tpu.matmul %1, %5, %cst_15 {dimension_numbers = #tpu.dot_dimension_numbers<[1], [0], [0], [1], [0, 0, 1, 1], [], []>} : vector<8x32xbf16>, vector<32x32xbf16>, vector<8x32xf32> -> vector<8x32xf32>
    %cst_16 = arith.constant dense<0.000000e+00> : vector<8x32xf32>
    %14 = tpu.matmul %1, %7, %cst_16 {dimension_numbers = #tpu.dot_dimension_numbers<[1], [0], [0], [1], [0, 0, 1, 1], [], []>} : vector<8x32xbf16>, vector<32x32xbf16>, vector<8x32xf32> -> vector<8x32xf32>
    %c0_17 = arith.constant 0 : index
    %c0_18 = arith.constant 0 : index
    %15 = vector.load %arg7[%c0_17, %c0_18] : memref<8x8xf32, #tpu.memory_space<vmem>>, vector<8x8xf32>
    %16 = tpu.concatenate %15, %15, %15, %15 in 1 : vector<8x8xf32>, vector<8x8xf32>, vector<8x8xf32>, vector<8x8xf32> -> vector<8x32xf32>
    %c0_19 = arith.constant 0 : index
    %c0_20 = arith.constant 0 : index
    %17 = vector.load %arg8[%c0_19, %c0_20] : memref<8x8xf32, #tpu.memory_space<vmem>>, vector<8x8xf32>
    %18 = tpu.concatenate %17, %17, %17, %17 in 1 : vector<8x8xf32>, vector<8x8xf32>, vector<8x8xf32>, vector<8x8xf32> -> vector<8x32xf32>
    %19 = tpu.iota {dimensions = array<i32: 1>} : vector<8x32xi32>
    %c2_i32 = arith.constant 2 : i32
    %c0_i32 = arith.constant 0 : i32
    %20 = arith.cmpi eq, %c2_i32, %c0_i32 : i32
    %c1_i32 = arith.constant 1 : i32
    %21 = arith.select %20, %c1_i32, %c2_i32 : i32
    %22 = vector.broadcast %21 : i32 to vector<8x32xi32>
    %23 = arith.remsi %19, %22 : vector<8x32xi32>
    %c0_i32_21 = arith.constant 0 : i32
    %24 = vector.broadcast %c0_i32_21 : i32 to vector<8x32xi32>
    %25 = arith.cmpi ne, %23, %24 : vector<8x32xi32>
    %c0_i32_22 = arith.constant 0 : i32
    %26 = vector.broadcast %c0_i32_22 : i32 to vector<8x32xi32>
    %27 = arith.cmpi slt, %23, %26 : vector<8x32xi32>
    %c0_i32_23 = arith.constant 0 : i32
    %28 = arith.cmpi slt, %21, %c0_i32_23 : i32
    %29 = vector.broadcast %28 : i1 to vector<8x32xi1>
    %30 = vector.broadcast %29 : vector<8x32xi1> to vector<8x32xi1>
    %31 = arith.xori %27, %30 : vector<8x32xi1>
    %32 = arith.andi %31, %25 : vector<8x32xi1>
    %33 = vector.broadcast %21 : i32 to vector<8x32xi32>
    %34 = arith.addi %23, %33 : vector<8x32xi32>
    %35 = arith.select %32, %34, %23 : vector<8x32xi1>, vector<8x32xi32>
    %c0_i32_24 = arith.constant 0 : i32
    %36 = vector.broadcast %c0_i32_24 : i32 to vector<8x32xi32>
    %37 = arith.cmpi eq, %35, %36 : vector<8x32xi32>
    %38 = vector.extract_strided_slice %12 {offsets = [0, 1], sizes = [8, 31], strides = [1, 1]} : vector<8x32xf32> to vector<8x31xf32>
    %39 = vector.extract_strided_slice %12 {offsets = [0, 0], sizes = [8, 1], strides = [1, 1]} : vector<8x32xf32> to vector<8x1xf32>
    %40 = tpu.concatenate %38, %39 in 1 : vector<8x31xf32>, vector<8x1xf32> -> vector<8x32xf32>
    %41 = vector.extract_strided_slice %12 {offsets = [0, 31], sizes = [8, 1], strides = [1, 1]} : vector<8x32xf32> to vector<8x1xf32>
    %42 = vector.extract_strided_slice %12 {offsets = [0, 0], sizes = [8, 31], strides = [1, 1]} : vector<8x32xf32> to vector<8x31xf32>
    %43 = tpu.concatenate %41, %42 in 1 : vector<8x1xf32>, vector<8x31xf32> -> vector<8x32xf32>
    %44 = arith.select %37, %40, %43 : vector<8x32xi1>, vector<8x32xf32>
    %45 = arith.mulf %12, %16 : vector<8x32xf32>
    %46 = arith.mulf %44, %18 : vector<8x32xf32>
    %47 = arith.addf %45, %46 : vector<8x32xf32>
    %48 = vector.extract_strided_slice %13 {offsets = [0, 1], sizes = [8, 31], strides = [1, 1]} : vector<8x32xf32> to vector<8x31xf32>
    %49 = vector.extract_strided_slice %13 {offsets = [0, 0], sizes = [8, 1], strides = [1, 1]} : vector<8x32xf32> to vector<8x1xf32>
    %50 = tpu.concatenate %48, %49 in 1 : vector<8x31xf32>, vector<8x1xf32> -> vector<8x32xf32>
    %51 = vector.extract_strided_slice %13 {offsets = [0, 31], sizes = [8, 1], strides = [1, 1]} : vector<8x32xf32> to vector<8x1xf32>
    %52 = vector.extract_strided_slice %13 {offsets = [0, 0], sizes = [8, 31], strides = [1, 1]} : vector<8x32xf32> to vector<8x31xf32>
    %53 = tpu.concatenate %51, %52 in 1 : vector<8x1xf32>, vector<8x31xf32> -> vector<8x32xf32>
    %54 = arith.select %37, %50, %53 : vector<8x32xi1>, vector<8x32xf32>
    %55 = arith.mulf %13, %16 : vector<8x32xf32>
    %56 = arith.mulf %54, %18 : vector<8x32xf32>
    %57 = arith.addf %55, %56 : vector<8x32xf32>
    %58 = tpu.iota {dimensions = array<i32: 0>} : vector<8x8xi32>
    %59 = tpu.iota {dimensions = array<i32: 1>} : vector<8x8xi32>
    %60 = arith.cmpi sgt, %59, %58 : vector<8x8xi32>
    %61 = vector.extract_strided_slice %47 {offsets = [0, 0], sizes = [8, 8], strides = [1, 1]} : vector<8x32xf32> to vector<8x8xf32>
    %62 = arith.truncf %61 : vector<8x8xf32> to vector<8x8xbf16>
    %63 = vector.extract_strided_slice %57 {offsets = [0, 0], sizes = [8, 8], strides = [1, 1]} : vector<8x32xf32> to vector<8x8xf32>
    %64 = arith.truncf %63 : vector<8x8xf32> to vector<8x8xbf16>
    %65 = vector.extract_strided_slice %14 {offsets = [0, 0], sizes = [8, 8], strides = [1, 1]} : vector<8x32xf32> to vector<8x8xf32>
    %66 = arith.truncf %65 : vector<8x8xf32> to vector<8x8xbf16>
    %cst_25 = arith.constant dense<0.000000e+00> : vector<8x8xf32>
    %67 = tpu.matmul %62, %64, %cst_25 {dimension_numbers = #tpu.dot_dimension_numbers<[1], [1], [0], [0], [0, 0, 1, 0], [], []>} : vector<8x8xbf16>, vector<8x8xbf16>, vector<8x8xf32> -> vector<8x8xf32>
    %cst_26 = arith.constant 0xFF800000 : f32
    %68 = vector.broadcast %cst_26 : f32 to vector<8x8xf32>
    %69 = arith.select %60, %67, %68 : vector<8x8xi1>, vector<8x8xf32>
    %cst_27 = arith.constant dense<0xFF800000> : vector<8xf32>
    %70 = vector.multi_reduction <maximumf>, %69, %cst_27 [1] : vector<8x8xf32> to vector<8xf32>
    %71 = vector.shape_cast %70 : vector<8xf32> to vector<8x1xf32>
    %72 = vector.broadcast %71 : vector<8x1xf32> to vector<8x8xf32>
    %73 = arith.subf %69, %72 : vector<8x8xf32>
    %74 = math.exp %73 : vector<8x8xf32>
    %cst_28 = arith.constant dense<0.000000e+00> : vector<8xf32>
    %75 = vector.multi_reduction <add>, %74, %cst_28 [1] : vector<8x8xf32> to vector<8xf32>
    %76 = vector.shape_cast %75 : vector<8xf32> to vector<8x1xf32>
    %77 = tpu.reciprocal %76 {approx = true} : vector<8x1xf32> -> vector<8x1xf32>
    %78 = vector.broadcast %77 : vector<8x1xf32> to vector<8x8xf32>
    %79 = arith.mulf %74, %78 : vector<8x8xf32>
    %80 = arith.truncf %79 : vector<8x8xf32> to vector<8x8xbf16>
    %cst_29 = arith.constant dense<0.000000e+00> : vector<8x8xf32>
    %81 = tpu.matmul %80, %66, %cst_29 {dimension_numbers = #tpu.dot_dimension_numbers<[1], [0], [0], [1], [0, 0, 1, 1], [], []>} : vector<8x8xbf16>, vector<8x8xbf16>, vector<8x8xf32> -> vector<8x8xf32>
    %82 = arith.truncf %81 : vector<8x8xf32> to vector<8x8xbf16>
    %c0_30 = arith.constant 0 : index
    %c0_31 = arith.constant 0 : index
    %83 = vector.load %arg11[%c0_30, %c0_31] : memref<8x32xbf16, #tpu.memory_space<vmem>>, vector<8x8xbf16>
    tpu.vector_store %arg11[%c0_30, %c0_31], %82 {strides = array<i32>} : memref<8x32xbf16, #tpu.memory_space<vmem>>, vector<8x8xbf16>,
    %84 = vector.extract_strided_slice %47 {offsets = [0, 8], sizes = [8, 8], strides = [1, 1]} : vector<8x32xf32> to vector<8x8xf32>
    %85 = arith.truncf %84 : vector<8x8xf32> to vector<8x8xbf16>
    %86 = vector.extract_strided_slice %57 {offsets = [0, 8], sizes = [8, 8], strides = [1, 1]} : vector<8x32xf32> to vector<8x8xf32>
    %87 = arith.truncf %86 : vector<8x8xf32> to vector<8x8xbf16>
    %88 = vector.extract_strided_slice %14 {offsets = [0, 8], sizes = [8, 8], strides = [1, 1]} : vector<8x32xf32> to vector<8x8xf32>
    %89 = arith.truncf %88 : vector<8x8xf32> to vector<8x8xbf16>
    %cst_32 = arith.constant dense<0.000000e+00> : vector<8x8xf32>
    %90 = tpu.matmul %85, %87, %cst_32 {dimension_numbers = #tpu.dot_dimension_numbers<[1], [1], [0], [0], [0, 0, 1, 0], [], []>} : vector<8x8xbf16>, vector<8x8xbf16>, vector<8x8xf32> -> vector<8x8xf32>
    %cst_33 = arith.constant 0xFF800000 : f32
    %91 = vector.broadcast %cst_33 : f32 to vector<8x8xf32>
    %92 = arith.select %60, %90, %91 : vector<8x8xi1>, vector<8x8xf32>
    %cst_34 = arith.constant dense<0xFF800000> : vector<8xf32>
    %93 = vector.multi_reduction <maximumf>, %92, %cst_34 [1] : vector<8x8xf32> to vector<8xf32>
    %94 = vector.shape_cast %93 : vector<8xf32> to vector<8x1xf32>
    %95 = vector.broadcast %94 : vector<8x1xf32> to vector<8x8xf32>
    %96 = arith.subf %92, %95 : vector<8x8xf32>
    %97 = math.exp %96 : vector<8x8xf32>
    %cst_35 = arith.constant dense<0.000000e+00> : vector<8xf32>
    %98 = vector.multi_reduction <add>, %97, %cst_35 [1] : vector<8x8xf32> to vector<8xf32>
    %99 = vector.shape_cast %98 : vector<8xf32> to vector<8x1xf32>
    %100 = tpu.reciprocal %99 {approx = true} : vector<8x1xf32> -> vector<8x1xf32>
    %101 = vector.broadcast %100 : vector<8x1xf32> to vector<8x8xf32>
    %102 = arith.mulf %97, %101 : vector<8x8xf32>
    %103 = arith.truncf %102 : vector<8x8xf32> to vector<8x8xbf16>
    %cst_36 = arith.constant dense<0.000000e+00> : vector<8x8xf32>
    %104 = tpu.matmul %103, %89, %cst_36 {dimension_numbers = #tpu.dot_dimension_numbers<[1], [0], [0], [1], [0, 0, 1, 1], [], []>} : vector<8x8xbf16>, vector<8x8xbf16>, vector<8x8xf32> -> vector<8x8xf32>
    %105 = arith.truncf %104 : vector<8x8xf32> to vector<8x8xbf16>
    %c0_37 = arith.constant 0 : index
    %c8 = arith.constant 8 : index
    %106 = vector.load %arg11[%c0_37, %c8] : memref<8x32xbf16, #tpu.memory_space<vmem>>, vector<8x8xbf16>
    tpu.vector_store %arg11[%c0_37, %c8], %105 {strides = array<i32>} : memref<8x32xbf16, #tpu.memory_space<vmem>>, vector<8x8xbf16>,
    %107 = vector.extract_strided_slice %47 {offsets = [0, 16], sizes = [8, 8], strides = [1, 1]} : vector<8x32xf32> to vector<8x8xf32>
    %108 = arith.truncf %107 : vector<8x8xf32> to vector<8x8xbf16>
    %109 = vector.extract_strided_slice %57 {offsets = [0, 16], sizes = [8, 8], strides = [1, 1]} : vector<8x32xf32> to vector<8x8xf32>
    %110 = arith.truncf %109 : vector<8x8xf32> to vector<8x8xbf16>
    %111 = vector.extract_strided_slice %14 {offsets = [0, 16], sizes = [8, 8], strides = [1, 1]} : vector<8x32xf32> to vector<8x8xf32>
    %112 = arith.truncf %111 : vector<8x8xf32> to vector<8x8xbf16>
    %cst_38 = arith.constant dense<0.000000e+00> : vector<8x8xf32>
    %113 = tpu.matmul %108, %110, %cst_38 {dimension_numbers = #tpu.dot_dimension_numbers<[1], [1], [0], [0], [0, 0, 1, 0], [], []>} : vector<8x8xbf16>, vector<8x8xbf16>, vector<8x8xf32> -> vector<8x8xf32>
    %cst_39 = arith.constant 0xFF800000 : f32
    %114 = vector.broadcast %cst_39 : f32 to vector<8x8xf32>
    %115 = arith.select %60, %113, %114 : vector<8x8xi1>, vector<8x8xf32>
    %cst_40 = arith.constant dense<0xFF800000> : vector<8xf32>
    %116 = vector.multi_reduction <maximumf>, %115, %cst_40 [1] : vector<8x8xf32> to vector<8xf32>
    %117 = vector.shape_cast %116 : vector<8xf32> to vector<8x1xf32>
    %118 = vector.broadcast %117 : vector<8x1xf32> to vector<8x8xf32>
    %119 = arith.subf %115, %118 : vector<8x8xf32>
    %120 = math.exp %119 : vector<8x8xf32>
    %cst_41 = arith.constant dense<0.000000e+00> : vector<8xf32>
    %121 = vector.multi_reduction <add>, %120, %cst_41 [1] : vector<8x8xf32> to vector<8xf32>
    %122 = vector.shape_cast %121 : vector<8xf32> to vector<8x1xf32>
    %123 = tpu.reciprocal %122 {approx = true} : vector<8x1xf32> -> vector<8x1xf32>
    %124 = vector.broadcast %123 : vector<8x1xf32> to vector<8x8xf32>
    %125 = arith.mulf %120, %124 : vector<8x8xf32>
    %126 = arith.truncf %125 : vector<8x8xf32> to vector<8x8xbf16>
    %cst_42 = arith.constant dense<0.000000e+00> : vector<8x8xf32>
    %127 = tpu.matmul %126, %112, %cst_42 {dimension_numbers = #tpu.dot_dimension_numbers<[1], [0], [0], [1], [0, 0, 1, 1], [], []>} : vector<8x8xbf16>, vector<8x8xbf16>, vector<8x8xf32> -> vector<8x8xf32>
    %128 = arith.truncf %127 : vector<8x8xf32> to vector<8x8xbf16>
    %c0_43 = arith.constant 0 : index
    %c16 = arith.constant 16 : index
    %129 = vector.load %arg11[%c0_43, %c16] : memref<8x32xbf16, #tpu.memory_space<vmem>>, vector<8x8xbf16>
    tpu.vector_store %arg11[%c0_43, %c16], %128 {strides = array<i32>} : memref<8x32xbf16, #tpu.memory_space<vmem>>, vector<8x8xbf16>,
    %130 = vector.extract_strided_slice %47 {offsets = [0, 24], sizes = [8, 8], strides = [1, 1]} : vector<8x32xf32> to vector<8x8xf32>
    %131 = arith.truncf %130 : vector<8x8xf32> to vector<8x8xbf16>
    %132 = vector.extract_strided_slice %57 {offsets = [0, 24], sizes = [8, 8], strides = [1, 1]} : vector<8x32xf32> to vector<8x8xf32>
    %133 = arith.truncf %132 : vector<8x8xf32> to vector<8x8xbf16>
    %134 = vector.extract_strided_slice %14 {offsets = [0, 24], sizes = [8, 8], strides = [1, 1]} : vector<8x32xf32> to vector<8x8xf32>
    %135 = arith.truncf %134 : vector<8x8xf32> to vector<8x8xbf16>
    %cst_44 = arith.constant dense<0.000000e+00> : vector<8x8xf32>
    %136 = tpu.matmul %131, %133, %cst_44 {dimension_numbers = #tpu.dot_dimension_numbers<[1], [1], [0], [0], [0, 0, 1, 0], [], []>} : vector<8x8xbf16>, vector<8x8xbf16>, vector<8x8xf32> -> vector<8x8xf32>
    %cst_45 = arith.constant 0xFF800000 : f32
    %137 = vector.broadcast %cst_45 : f32 to vector<8x8xf32>
    %138 = arith.select %60, %136, %137 : vector<8x8xi1>, vector<8x8xf32>
    %cst_46 = arith.constant dense<0xFF800000> : vector<8xf32>
    %139 = vector.multi_reduction <maximumf>, %138, %cst_46 [1] : vector<8x8xf32> to vector<8xf32>
    %140 = vector.shape_cast %139 : vector<8xf32> to vector<8x1xf32>
    %141 = vector.broadcast %140 : vector<8x1xf32> to vector<8x8xf32>
    %142 = arith.subf %138, %141 : vector<8x8xf32>
    %143 = math.exp %142 : vector<8x8xf32>
    %cst_47 = arith.constant dense<0.000000e+00> : vector<8xf32>
    %144 = vector.multi_reduction <add>, %143, %cst_47 [1] : vector<8x8xf32> to vector<8xf32>
    %145 = vector.shape_cast %144 : vector<8xf32> to vector<8x1xf32>
    %146 = tpu.reciprocal %145 {approx = true} : vector<8x1xf32> -> vector<8x1xf32>
    %147 = vector.broadcast %146 : vector<8x1xf32> to vector<8x8xf32>
    %148 = arith.mulf %143, %147 : vector<8x8xf32>
    %149 = arith.truncf %148 : vector<8x8xf32> to vector<8x8xbf16>
    %cst_48 = arith.constant dense<0.000000e+00> : vector<8x8xf32>
    %150 = tpu.matmul %149, %135, %cst_48 {dimension_numbers = #tpu.dot_dimension_numbers<[1], [0], [0], [1], [0, 0, 1, 1], [], []>} : vector<8x8xbf16>, vector<8x8xbf16>, vector<8x8xf32> -> vector<8x8xf32>
    %151 = arith.truncf %150 : vector<8x8xf32> to vector<8x8xbf16>
    %c0_49 = arith.constant 0 : index
    %c24 = arith.constant 24 : index
    %152 = vector.load %arg11[%c0_49, %c24] : memref<8x32xbf16, #tpu.memory_space<vmem>>, vector<8x8xbf16>
    tpu.vector_store %arg11[%c0_49, %c24], %151 {strides = array<i32>} : memref<8x32xbf16, #tpu.memory_space<vmem>>, vector<8x8xbf16>,
    %c0_50 = arith.constant 0 : index
    %c0_51 = arith.constant 0 : index
    %153 = vector.load %arg11[%c0_50, %c0_51] : memref<8x32xbf16, #tpu.memory_space<vmem>>, vector<8x32xbf16>
    %cst_52 = arith.constant dense<0.000000e+00> : vector<8x32xf32>
    %154 = tpu.matmul %153, %9, %cst_52 {dimension_numbers = #tpu.dot_dimension_numbers<[1], [0], [0], [1], [0, 0, 1, 1], [], []>} : vector<8x32xbf16>, vector<32x32xbf16>, vector<8x32xf32> -> vector<8x32xf32>
    %c0_53 = arith.constant 0 : index
    %c0_54 = arith.constant 0 : index
    %c0_55 = arith.constant 0 : index
    %155 = vector.load %arg10[%c0_53, %c0_54, %c0_55] : memref<1x8x32xf32, #tpu.memory_space<vmem>>, vector<1x8x32xf32>
    %156 = vector.shape_cast %155 : vector<1x8x32xf32> to vector<8x32xf32>
    %157 = vector.shape_cast %154 : vector<8x32xf32> to vector<1x8x32xf32>
    tpu.vector_store %arg10[%c0_53, %c0_54, %c0_55], %157 {strides = array<i32>} : memref<1x8x32xf32, #tpu.memory_space<vmem>>, vector<1x8x32xf32>,
    return
  }
  func.func @transform_0(%arg0: i32, %arg1: memref<2xi32, #tpu.memory_space<smem>>) -> (i32, i32, i32) {
    %c0_i32 = arith.constant 0 : i32
    %c0_i32_0 = arith.constant 0 : i32
    %c0_i32_1 = arith.constant 0 : i32
    return %arg0, %c0_i32, %c0_i32_0 : i32, i32, i32
  }
  func.func @transform_1(%arg0: i32, %arg1: memref<2xi32, #tpu.memory_space<smem>>) -> (i32, i32, i32) {
    %0 = arith.index_cast %arg0 : i32 to index
    %1 = memref.load %arg1[%0] : memref<2xi32, #tpu.memory_space<smem>>
    %c0_i32 = arith.constant 0 : i32
    %c0_i32_0 = arith.constant 0 : i32
    %c0_i32_1 = arith.constant 0 : i32
    return %1, %c0_i32, %c0_i32_0 : i32, i32, i32
  }
  func.func @transform_2(%arg0: i32, %arg1: memref<2xi32, #tpu.memory_space<smem>>) -> (i32, i32, i32) {
    %0 = arith.index_cast %arg0 : i32 to index
    %1 = memref.load %arg1[%0] : memref<2xi32, #tpu.memory_space<smem>>
    %c0_i32 = arith.constant 0 : i32
    %c0_i32_0 = arith.constant 0 : i32
    %c0_i32_1 = arith.constant 0 : i32
    return %1, %c0_i32, %c0_i32_0 : i32, i32, i32
  }
  func.func @transform_3(%arg0: i32, %arg1: memref<2xi32, #tpu.memory_space<smem>>) -> (i32, i32, i32) {
    %0 = arith.index_cast %arg0 : i32 to index
    %1 = memref.load %arg1[%0] : memref<2xi32, #tpu.memory_space<smem>>
    %c0_i32 = arith.constant 0 : i32
    %c0_i32_0 = arith.constant 0 : i32
    %c0_i32_1 = arith.constant 0 : i32
    return %1, %c0_i32, %c0_i32_0 : i32, i32, i32
  }
  func.func @transform_4(%arg0: i32, %arg1: memref<2xi32, #tpu.memory_space<smem>>) -> (i32, i32, i32) {
    %0 = arith.index_cast %arg0 : i32 to index
    %1 = memref.load %arg1[%0] : memref<2xi32, #tpu.memory_space<smem>>
    %c0_i32 = arith.constant 0 : i32
    %c0_i32_0 = arith.constant 0 : i32
    %c0_i32_1 = arith.constant 0 : i32
    return %1, %c0_i32, %c0_i32_0 : i32, i32, i32
  }
  func.func @transform_5(%arg0: i32, %arg1: memref<2xi32, #tpu.memory_space<smem>>) -> (i32, i32) {
    %c0_i32 = arith.constant 0 : i32
    %c0_i32_0 = arith.constant 0 : i32
    %c0_i32_1 = arith.constant 0 : i32
    return %c0_i32, %c0_i32_0 : i32, i32
  }
  func.func @transform_6(%arg0: i32, %arg1: memref<2xi32, #tpu.memory_space<smem>>) -> (i32, i32) {
    %c0_i32 = arith.constant 0 : i32
    %c0_i32_0 = arith.constant 0 : i32
    %c0_i32_1 = arith.constant 0 : i32
    return %c0_i32, %c0_i32_0 : i32, i32
  }
  func.func @transform_7(%arg0: i32, %arg1: memref<2xi32, #tpu.memory_space<smem>>) -> (i32, i32, i32) {
    %c0_i32 = arith.constant 0 : i32
    %c0_i32_0 = arith.constant 0 : i32
    %c0_i32_1 = arith.constant 0 : i32
    return %arg0, %c0_i32, %c0_i32_0 : i32, i32, i32
  }
  func.func @transform_8(%arg0: i32, %arg1: memref<2xi32, #tpu.memory_space<smem>>) -> (i32, i32, i32) {
    %c0_i32 = arith.constant 0 : i32
    %c0_i32_0 = arith.constant 0 : i32
    %c0_i32_1 = arith.constant 0 : i32
    return %arg0, %c0_i32, %c0_i32_0 : i32, i32, i32
  }
}

</mosaic_0001>

<bundles_post_ra>
// kernel: tpu_custom_call.1
= control target key start
LH: loop header
LB: loop body
LE: loop exit
PB: predicated region body
PF: predicated region fallthrough
CT: control target
= control target key end

     0   :  { %s3367_s0 = inlined_call_operand.hbm [shape: s32[2], index: 0, kind: input, shape index: {}]   ;;  %s3368_s1 = inlined_call_operand.hbm [shape: bf16[2,8,32], index: 1, kind: input, shape index: {}]   ;;  %s3369_s2 = inlined_call_operand.hbm [shape: bf16[3,32,32], index: 2, kind: input, shape index: {}]   ;;  %s3370_s3 = inlined_call_operand.hbm [shape: bf16[3,32,32], index: 3, kind: input, shape index: {}]   ;;  %s3371_s4 = inlined_call_operand.hbm [shape: bf16[3,32,32], index: 4, kind: input, shape index: {}]   ;;  %s3372_s5 = inlined_call_operand.hbm [shape: bf16[3,32,32], index: 5, kind: input, shape index: {}]   ;;  %s3373_s6 = inlined_call_operand.hbm [shape: f32[8,8], index: 6, kind: input, shape index: {}]   ;;  %s3374_s7 = inlined_call_operand.hbm [shape: f32[8,8], index: 7, kind: input, shape index: {}]   ;;  %s3375_s8 = inlined_call_operand.hbm [shape: f32[2,1,8], index: 8, kind: input, shape index: {}]   ;;  %s3376_s9 = inlined_call_operand.hbm [shape: f32[2,8,32], index: 9, kind: output, shape index: {}]  }
   0x1   :  { %3417 = sst [smem:[#allocation55_spill]] %s3368_s1  ;;  %s1978_s11 = scalar_lea.hbm %s3367_s0, 16 }
   0x2   :  { %3418 = sst [smem:[#allocation56_spill]] %s3369_s2  ;;  %p1979_p0 = scmp.ne.s32.totalorder %s3367_s0, %s1978_s11 }
   0x3   :  { %3419 = sst [smem:[#allocation57_spill]] %s3370_s3  ;;  %p1982_p1 = scmp.lt.u32.totalorder %s1978_s11, %s3367_s0 }
   0x4   :  { %3420 = sst [smem:[#allocation58_spill]] %s3371_s4 }
   0x5   :  { %3421 = sst [smem:[#allocation59_spill]] %s3372_s5  ;;  %p1984_p2 = pnand %p1982_p1, %p1979_p0 }
   0x6   :  { %3422 = sst [smem:[#allocation60_spill]] %s3373_s6 }
   0x7   :  { %3423 = sst [smem:[#allocation61_spill]] %s3374_s7 }
   0x8   :  { %3424 = sst [smem:[#allocation62_spill]] %s3375_s8 }
   0x9   :  { %3425 = sst [smem:[#allocation63_spill]] %s3376_s9 }
   0xa   :  { %1987 = shalt.err (!%p1984_p2)  }
   0xb   :  { %s2414_s16 = smov [#allocation4]  }
   0xc   :  { %15 = dma.hbm_to_smem %s3367_s0, 16, %s2414_s16, [#allocation3] }
   0xd   :  { %2316 = dma.done.wait [#allocation3], 16 }
   0xe   :  { %2317 = vsyncadd [#allocation3], 4294967280 }
   0xf   :  { %17 = sfence }
  0x10   :  { %18 = vsyncpa [#allocation6], 0 }
  0x11   :  { %20 = vsyncpa [#allocation6 + $0x1], 0 }
  0x12   :  { %21 = vsyncpa [#allocation9], 0 }
  0x13   :  { %23 = vsyncpa [#allocation9 + $0x1], 0 }
  0x14   :  { %24 = vsyncpa [#allocation12], 0 }
  0x15   :  { %26 = vsyncpa [#allocation12 + $0x1], 0 }
  0x16   :  { %27 = vsyncpa [#allocation15], 0 }
  0x17   :  { %28 = vsyncpa [#allocation18], 0 }
  0x18   :  { %30 = vsyncpa [#allocation18 + $0x1], 0 }
  0x19   :  { %31 = vsyncpa [#allocation7], 0 }
  0x1a   :  { %33 = vsyncpa [#allocation7 + $0x1], 0  ;;  %s2500_s19 = smov 0   ;;  %s2502_s20 = smov 0  }
  0x1b   :  { %s2504_s21 = smov 0   ;;  %s2506_s0 = smov 0  }
  0x1c   :  { %s2508_s22 = smov 0   ;;  %s2510_s23 = smov 0  }
  0x1d   :  { %s2512_s24 = smov 0   ;;  %s2514_s25 = smov 0  }
  0x1e   :  { %s2516_s26 = smov 0   ;;  %s2518_s27 = smov 0  }
  0x1f   :  { %s2520_s28 = smov 0   ;;  %s2522_s29 = smov 0  }
  0x20   :  { %s2524_s30 = smov 0   ;;  %s2526_s10 = smov 0  }
  0x21   :  { %s2528_s11 = smov 0   ;;  %s2530_s12 = smov 0  }
  0x22 LB: > { %3426 = sst [smem:[#allocation37_spill]] %s2352_s19  ;;  %s2415_s13 = smov [#allocation14]   ;;  %s2412_s12 = sphi %s2530_s12, %s3550_s12   ;;  %s2408_s11 = sphi %s2528_s11, %s3541_s11   ;;  %s2404_s10 = sphi %s2526_s10, %s3549_s10   ;;  %s2400_s30 = sphi %s2524_s30, %s3548_s30   ;;  %s2396_s29 = sphi %s2522_s29, %s3539_s29   ;;  %s2392_s28 = sphi %s2520_s28, %s3547_s28   ;;  %s2388_s27 = sphi %s2518_s27, %s3537_s27   ;;  %s2384_s26 = sphi %s2516_s26, %s3536_s26   ;;  %s2380_s25 = sphi %s2514_s25, %s3546_s25   ;;  %s2376_s24 = sphi %s2512_s24, %s3545_s24   ;;  %s2372_s23 = sphi %s2510_s23, %s3534_s23   ;;  %s2368_s22 = sphi %s2508_s22, %s3544_s22   ;;  %s2364_s0 = sphi %s2506_s0, %s3543_s0   ;;  %s2360_s21 = sphi %s2504_s21, %s3542_s21   ;;  %s2356_s20 = sphi %s2502_s20, %s3532_s20   ;;  %s2352_s19 = sphi %s2500_s19, %s3531_s19  }
  0x23   : > { %3427 = sst [smem:[#allocation38_spill]] %s2356_s20  ;;  %s289_s14 = sshll.u32 %s2415_s13, 4  ;;  %s290_s14 = int_to_ptr.vmem [resolvable:$true] %s289_s14 }
  0x24   : > { %3428 = sst [smem:[#allocation39_spill]] %s2360_s21  ;;  %s2581_s15 = sadd.s32 4294967295, %s2412_s12  }
  0x25   : > { %3429 = sst [smem:[#allocation40_spill]] %s2372_s23  ;;  %p1565_p3 = scmp.ge.s32.totalorder %s2412_s12, 1 }
  0x26   : > { %3430 = sst [smem:[#allocation41_spill]] %s2384_s26  ;;  %p3385_p4 = scmp.eq.s32.totalorder %s2581_s15, 0 }
  0x27   : > { %3431 = sst [smem:[#allocation42_spill]] %s2392_s28  ;;  %p276_p5 = scmp.lt.s32.totalorder %s2412_s12, 3 }
  0x28   : > { %3432 = sst [smem:[#allocation43_spill]] %s2396_s29  ;;  %s2600_s18 = sadd.s32 1, %s2412_s12  }
  0x29   : > { %3433 = sst [smem:[#allocation44_spill]] %s2400_s30  ;;  %p2586_p6 = pnand %p1565_p3, %p276_p5 }
  0x2a   : > { %3434 = sst [smem:[#allocation45_spill]] %s2408_s11  ;;  %s3438_s6 = sld [smem:[#allocation60_spill]] }
  0x2b   : > { %s3435_s16 = scalar_select %p2586_p6, 1, 0 }
  0x2c   : > { %p1765_p8 = pneg %p2586_p6  ;;  %s2604_s13 = sld [smem:[#allocation4 + %s2412_s12]] }
  0x2d   : > { %3436 = sst [smem:[#allocation46_spill]] %s3435_s16 }
  0x2e   : > { %p2595_p9 = pnand %p1765_p8, %p3385_p4 }
  0x30   : > { %s1988_s8 = scalar_lea.hbm %s3438_s6, 128  ;;  %p3391_p12 = pneg %p2595_p9 }
  0x31   : > { %p1989_p11 = scmp.ne.s32.totalorder %s3438_s6, %s1988_s8  ;;  %p1995_p1 = scmp.lt.u32.totalorder %s1988_s8, %s3438_s6 }
  0x33   : > { %p1991_p13 = pnand %p3391_p12, %p1989_p11 }
  0x35   : > { %p1992_p0 = pneg %p1991_p13 }
  0x37   : > { %p1997_p2 = pnand %p1995_p1, %p1992_p0 }
  0x39   : > { %2000 = shalt.err (!%p1997_p2)
}
  0x3a   : > { %s2001_s20 = scalar_lea.vmem %s290_s14, 128  ;;  %p2009_p7 = scmp.lt.s32.totalorder %s290_s14, %s290_s14 }
  0x3b   : > { %p2002_p3 = scmp.ne.s32.totalorder %s290_s14, %s2001_s20  ;;  %p2010_p4 = scmp.lt.s32.totalorder %s2001_s20, %s2001_s20 }
  0x3d   : > { %p2004_p5 = pnand %p2002_p3, %p3391_p12  ;;  %p2011_p10 = por %p2010_p4, %p2009_p7 }
  0x3f   : > { %p2005_p8 = pneg %p2004_p5 }
  0x41   : > { %p2012_p6 = pnand %p2011_p10, %p2005_p8 }
  0x43   : > { %2015 = shalt.err (!%p2012_p6)
}
  0x44   : > { %1768 = dma.hbm_to_vmem [thread:$0]  (!%p2595_p9), %s3438_s6, 128, %s290_s14, [#allocation15]  }
  0x45   : > { %s70_s8 = sld [smem:[#allocation4 + %s2600_s18]]  ;;  %s74_s9 = sadd.s32 1, %s2396_s29 }
  0x46   : > { %p81_p4 = scmp.ne.s32.totalorder %s2396_s29, %s2392_s28  ;;  %p87_p6 = scmp.ne.s32.totalorder %s2392_s28, %s2388_s27 }
  0x47   : > { %p3392_p7 = scmp.lt.s32.totalorder %s2412_s12, 2  ;;  %p3439_p10 = scmp.eq.s32.totalorder %s2412_s12, 0 }
  0x48   : > { %p3441_p13 = scmp.eq.s32.totalorder %s2581_s15, 0  ;;  %s331_s14 = sand.u32 1, %s2396_s29  }
  0x49   : > { %p2638_p11 = por %p81_p4, %p3439_p10  ;;  %s1571_s27 = sshll.u32 %s331_s14, 4 }
  0x4a   : > { %p2644_p0 = por %p87_p6, %p3441_p13  ;;  %s333_s5 = scalar_lea.vmem [#allocation8], %s1571_s27 }
  0x4b   : > { %p2653_p1 = pnand %p3392_p7, %p2638_p11  ;;  %s71_s3 = ssub.s32 %s2604_s13, %s70_s8 }
  0x4c   : > { %s3442_s21 = scalar_select %p2644_p0, 1, 0 }
  0x4d   : > { %p72_p2 = scmp.eq.s32.totalorder %s71_s3, 0  ;;  %s341_s19 = sshll.u32 %s333_s5, 4  ;;  %s2670_s19 = int_to_ptr.vmem [resolvable:$true] %s341_s19 }
  0x4e   : > { %3443 = sst [smem:[#allocation47_spill]] %s3442_s21  ;;  %s130_s3 = sadd.s32 1, %s2372_s23 }
  0x4f   : > { %s1740_s6 = scalar_select %p2638_p11, [#allocation4], [#allocation20] }
  0x50   : > { %s2661_s21 = scalar_select %p72_p2, %s2396_s29, %s74_s9  }
  0x51   : > { %s1741_s14 = scalar_select %p2638_p11, %s2412_s12, 0 }
  0x52   : > { %3445 = sst [smem:[#allocation48_spill]] %s2661_s21  ;;  %s3552_s6 = smov (!%p3392_p7, %s1740_s6), [#allocation24] }
  0x53   : > { %s3554_s14 = smov (!%p3392_p7, %s1741_s14), 0  ;;  %s2673_s8 = sld [smem:[#allocation4 + %s2412_s12]] }
  0x54   : > { %s334_s13 = sld [smem:[%s3552_s6 + %s3554_s14]]  ;;  %s3447_s29 = sand.u32 1, %s2412_s12  }
  0x55   : > { %s2676_s27 = sld [smem:[#allocation4 + %s2600_s18]]  ;;  %s2690_s28 = scalar_lea.sflag [#allocation9], %s3447_s29 }
  0x56   : > { %s3446_s2 = sld [smem:[#allocation56_spill]]  ;;  %p2018_p4 = pneg %p2653_p1 }
  0x5a   : > { %s1620_s5 = sshll.u32 %s334_s13, 8 }
  0x5c   : > { %s2684_s20 = scalar_lea.hbm %s3446_s2, %s1620_s5  ;;  %s2021_s13 = scalar_lea.hbm %s3446_s2, 768 }
  0x5d   : > { %s2016_s6 = scalar_lea.hbm %s2684_s20, 256  ;;  %p2022_p11 = scmp.lt.u32.totalorder %s2684_s20, %s3446_s2 }
  0x5e   : > { %p2017_p8 = scmp.ne.s32.totalorder %s2684_s20, %s2016_s6  ;;  %p2023_p13 = scmp.lt.u32.totalorder %s2021_s13, %s2016_s6 }
  0x5f   : > { %p2025_p12 = scmp.lt.u32.totalorder %s2016_s6, %s2684_s20 }
  0x60   : > { %p2019_p6 = pnand %p2018_p4, %p2017_p8  ;;  %p2024_p2 = por %p2023_p13, %p2022_p11 }
  0x62   : > { %p2020_p10 = pneg %p2019_p6  ;;  %p2026_p7 = por %p2025_p12, %p2024_p2 }
  0x64   : > { %p2027_p5 = pnand %p2026_p7, %p2020_p10 }
  0x66   : > { %2030 = shalt.err (!%p2027_p5)
}
  0x67   : > { %s2031_s29 = scalar_lea.vmem %s2670_s19, 256  ;;  %s2416_s14 = smov [#allocation8]  }
  0x68   : > { %p2032_p8 = scmp.ne.s32.totalorder %s2670_s19, %s2031_s29  ;;  %s2036_s21 = sshll.u32 %s2416_s14, 4  ;;  %s2037_s21 = int_to_ptr.vmem [resolvable:$false] %s2036_s21 }
  0x69   : > { %s2038_s5 = scalar_lea.vmem %s2037_s21, 512  ;;  %p2039_p0 = scmp.lt.s32.totalorder %s2670_s19, %s2037_s21 }
  0x6a   : > { %p2034_p6 = pnand %p2032_p8, %p2018_p4  ;;  %p2040_p11 = scmp.lt.s32.totalorder %s2038_s5, %s2031_s29 }
  0x6c   : > { %p2035_p3 = pneg %p2034_p6  ;;  %p2041_p13 = por %p2040_p11, %p2039_p0 }
  0x6e   : > { %p2042_p12 = pnand %p2041_p13, %p2035_p3 }
  0x70   : > { %2045 = shalt.err (!%p2042_p12)
}
  0x71   : > { %s3394_s6 = smov 64   ;;  %s3396_s13 = smov 4  }
  0x72   : > { %1780 = dma.hbm_to_vmem [thread:$0]  (!%p2653_p1), %s2684_s20, 256, %s2670_s19, %s2690_s28, %s3394_s6, %s3394_s6, %s3396_s13  }
  0x73   : > { %p3448_p7 = scmp.eq.s32.totalorder %s2412_s12, 0  ;;  %p3449_p0 = scmp.ne.s32.totalorder %s2372_s23, %s2368_s22 }
  0x74   : > { %p3451_p5 = scmp.eq.s32.totalorder %s2581_s15, 0  ;;  %p3452_p4 = scmp.ne.s32.totalorder %s2368_s22, %s2364_s0 }
  0x75   : > { %p2726_p3 = por %p3449_p0, %p3448_p7  ;;  %s375_s16 = sand.u32 1, %s2372_s23  }
  0x76   : > { %p2735_p10 = por %p3452_p4, %p3451_p5  ;;  %s127_s14 = ssub.s32 %s2673_s8, %s2676_s27 }
  0x77   : > { %s1577_s21 = sshll.u32 %s375_s16, 4  ;;  %p128_p2 = scmp.eq.s32.totalorder %s127_s14, 0 }
  0x78   : > { %s3453_s29 = scalar_select %p2735_p10, 1, 0 }
  0x79   : > { %s1746_s19 = scalar_select %p2726_p3, [#allocation4], [#allocation22] }
  0x7a   : > { %s2747_s20 = scalar_select %p128_p2, %s2372_s23, %s130_s3  }
  0x7b   : > { %s1747_s5 = scalar_select %p2726_p3, %s2412_s12, 0 }
  0x7c   : > { %3454 = sst [smem:[#allocation49_spill]] %s2747_s20  ;;  %p3455_p1 = scmp.lt.s32.totalorder %s2412_s12, 2 }
  0x7d   : > { %s377_s0 = scalar_lea.vmem [#allocation11], %s1577_s21  ;;  %s2419_s16 = smov [#allocation16]  }
  0x7e   : > { %s3556_s19 = smov (!%p3455_p1, %s1746_s19), [#allocation26]  ;;  %p3456_p8 = pmov %p3455_p1 }
  0x7f   : > { %s385_s6 = sshll.u32 %s377_s0, 4  ;;  %p3457_p6 = pmov %p3455_p1  ;;  %s2764_s6 = int_to_ptr.vmem [resolvable:$true] %s385_s6 }
  0x80   : > { %s3558_s5 = smov (!%p3456_p8, %s1747_s5), 0  ;;  %s300_s3 = sshll.u32 %s2419_s16, 4  ;;  %s301_s3 = int_to_ptr.vmem [resolvable:$true] %s300_s3 }
  0x81   : > { %p2760_p11 = pnand %p3457_p6, %p2726_p3  ;;  %s378_s27 = sld [smem:[%s3556_s19 + %s3558_s5]] }
  0x82   : > { %s3459_s7 = sld [smem:[#allocation61_spill]]  ;;  %p3460_p12 = pneg %p2595_p9 }
  0x83   : > { %s3458_s8 = scalar_select %p2760_p11, 1, 0 }
  0x88   : > { %s2046_s2 = scalar_lea.hbm %s3459_s7, 128 }
  0x89   : > { %p2047_p13 = scmp.ne.s32.totalorder %s3459_s7, %s2046_s2  ;;  %p2053_p3 = scmp.lt.u32.totalorder %s2046_s2, %s3459_s7 }
  0x8b   : > { %p2049_p7 = pnand %p2047_p13, %p3460_p12 }
  0x8d   : > { %p2050_p0 = pneg %p2049_p7 }
  0x8f   : > { %p2055_p5 = pnand %p2053_p3, %p2050_p0 }
  0x91   : > { %2058 = shalt.err (!%p2055_p5)
}
  0x92   : > { %s2059_s19 = scalar_lea.vmem %s301_s3, 128  ;;  %p3461_p2 = pmov %p3460_p12 }
  0x93   : > { %p2060_p4 = scmp.ne.s32.totalorder %s301_s3, %s2059_s19  ;;  %p2067_p6 = scmp.lt.s32.totalorder %s301_s3, %s301_s3 }
  0x94   : > { %p2068_p10 = scmp.lt.s32.totalorder %s2059_s19, %s2059_s19 }
  0x95   : > { %p2062_p1 = pnand %p2060_p4, %p3461_p2 }
  0x96   : > { %p2069_p11 = por %p2068_p10, %p2067_p6 }
  0x97   : > { %p2063_p8 = pneg %p2062_p1 }
  0x99   : > { %p2070_p12 = pnand %p2069_p11, %p2063_p8 }
  0x9b   : > { %2073 = shalt.err (!%p2070_p12)
}
  0x9c   : > { %1771 = dma.hbm_to_vmem [thread:$0]  (!%p2595_p9), %s3459_s7, 128, %s301_s3, [#allocation15]  }
  0x9d   : > { %s1622_s2 = sshll.u32 %s378_s27, 8  ;;  %s3462_s4 = sld [smem:[#allocation58_spill]] }
  0x9e   : > { %s3463_s16 = sand.u32 1, %s2412_s12   ;;  %p3464_p11 = scmp.ne.s32.totalorder %s3458_s8, 0 }
  0x9f   : > { %s2793_s14 = scalar_lea.sflag [#allocation12], %s3463_s16 }
  0xa0   : > { %p2076_p13 = pneg %p3464_p11 }
  0xa3   : > { %s2789_s0 = scalar_lea.hbm %s3462_s4, %s1622_s2  ;;  %s2079_s9 = scalar_lea.hbm %s3462_s4, 768 }
  0xa4   : > { %s2074_s17 = scalar_lea.hbm %s2789_s0, 256  ;;  %p2080_p0 = scmp.lt.u32.totalorder %s2789_s0, %s3462_s4 }
  0xa5   : > { %p2075_p10 = scmp.ne.s32.totalorder %s2789_s0, %s2074_s17  ;;  %p2081_p3 = scmp.lt.u32.totalorder %s2079_s9, %s2074_s17 }
  0xa6   : > { %p2083_p4 = scmp.lt.u32.totalorder %s2074_s17, %s2789_s0 }
  0xa7   : > { %p2077_p9 = pnand %p2076_p13, %p2075_p10  ;;  %p2082_p5 = por %p2081_p3, %p2080_p0 }
  0xa9   : > { %p2078_p7 = pneg %p2077_p9  ;;  %p2084_p2 = por %p2083_p4, %p2082_p5 }
  0xab   : > { %p2085_p1 = pnand %p2084_p2, %p2078_p7 }
  0xad   : > { %2088 = shalt.err (!%p2085_p1)
}
  0xae   : > { %s2089_s23 = scalar_lea.vmem %s2764_s6, 256  ;;  %s2420_s13 = smov [#allocation11]  }
  0xaf   : > { %p2090_p8 = scmp.ne.s32.totalorder %s2764_s6, %s2089_s23  ;;  %s2094_s2 = sshll.u32 %s2420_s13, 4  ;;  %s2095_s2 = int_to_ptr.vmem [resolvable:$false] %s2094_s2 }
  0xb0   : > { %s2096_s20 = scalar_lea.vmem %s2095_s2, 512  ;;  %p2097_p10 = scmp.lt.s32.totalorder %s2764_s6, %s2095_s2 }
  0xb1   : > { %p2092_p6 = pnand %p2090_p8, %p2076_p13  ;;  %p2098_p9 = scmp.lt.s32.totalorder %s2096_s20, %s2089_s23 }
  0xb3   : > { %p2093_p12 = pneg %p2092_p6  ;;  %p2099_p0 = por %p2098_p9, %p2097_p10 }
  0xb5   : > { %p2100_p3 = pnand %p2099_p0, %p2093_p12 }
  0xb7   : > { %2103 = shalt.err (!%p2100_p3)
}
  0xb8   : > { %s3465_s5 = smov 4   ;;  %s3466_s16 = smov 64  }
  0xb9   : > { %1790 = dma.hbm_to_vmem [thread:$0]  (!%p3464_p11), %s2789_s0, 256, %s2764_s6, %s2793_s14, %s3466_s16, %s3466_s16, %s3465_s5  }
  0xba   : > { %s1564_s8 = sadd.s32 4294967294, %s2412_s12   ;;  %s43_s17 = ssub.s32 %s2412_s12, %s2600_s18 }
  0xbb   : > { %p44_p13 = scmp.eq.s32.totalorder %s43_s17, 0  ;;  %s46_s27 = sadd.s32 1, %s2408_s11 }
  0xbc   : > { %p53_p7 = scmp.ne.s32.totalorder %s2408_s11, %s2404_s10  ;;  %p59_p5 = scmp.ne.s32.totalorder %s2404_s10, %s2400_s30 }
  0xbd   : > { %s2833_s3 = scalar_select %p44_p13, %s2408_s11, %s46_s27  }
  0xbe   : > { %p3468_p4 = scmp.eq.s32.totalorder %s2412_s12, 0  ;;  %p3469_p1 = scmp.eq.s32.totalorder %s2581_s15, 0 }
  0xbf   : > { %3467 = sst [smem:[#allocation50_spill]] %s2833_s3  ;;  %p263_p6 = scmp.eq.s32.totalorder %s2581_s15, 1 }
  0xc0   : > { %p55_p2 = por %p3468_p4, %p53_p7  ;;  %p2839_p8 = por %p3469_p1, %p59_p5 }
  0xc1   : > { %p269_p12 = scmp.eq.s32.totalorder %s1564_s8, 1  ;;  %s2845_s21 = sand.u32 1, %s2408_s11  }
  0xc2   : > { %s3470_s9 = scalar_select %p2839_p8, 1, 0 }
  0xc3   : > { %s1570_s6 = sshll.u32 %s2412_s12, 6  ;;  %p2848_p11 = por %p263_p6, %p53_p7 }
  0xc4   : > { %p2852_p10 = por %p269_p12, %p59_p5  ;;  %s1569_s23 = sshll.u32 %s2845_s21, 2 }
  0xc5   : > { %s3471_s0 = scalar_select %p2848_p11, 1, 0 }
  0xc6   : > { %s3473_s19 = scalar_select %p2852_p10, 1, 0 }
  0xc7   : > { %3472 = sst [smem:[#allocation51_spill]] %s3471_s0  ;;  %s315_s8 = scalar_lea.vmem [#allocation5], %s1569_s23 }
  0xc8   : > { %3474 = sst [smem:[#allocation52_spill]] %s3473_s19  ;;  %s3475_s1 = sld [smem:[#allocation55_spill]] }
  0xc9   : > { %s322_s17 = sshll.u32 %s315_s8, 4  ;;  %p3476_p9 = scmp.lt.s32.totalorder %s2412_s12, 2  ;;  %s2868_s17 = int_to_ptr.vmem [resolvable:$true] %s322_s17 }
  0xca   : > { %s312_s4 = scalar_lea.sflag [#allocation6], %s2845_s21 }
  0xcb   : > { %p2864_p0 = pnand %p3476_p9, %p55_p2 }
  0xcd   : > { %s3477_s27 = scalar_select %p2864_p0, 1, 0 }
  0xce   : > { %s2860_s20 = scalar_lea.hbm %s3475_s1, %s1570_s6  ;;  %p3410_p13 = pneg %p2864_p0 }
  0xcf   : > { %s2104_s7 = scalar_lea.hbm %s2860_s20, 64  ;;  %s2109_s13 = scalar_lea.hbm %s3475_s1, 128 }
  0xd0   : > { %p2105_p3 = scmp.ne.s32.totalorder %s2860_s20, %s2104_s7  ;;  %p2110_p4 = scmp.lt.u32.totalorder %s2860_s20, %s3475_s1 }
  0xd1   : > { %p2111_p2 = scmp.lt.u32.totalorder %s2109_s13, %s2104_s7  ;;  %p2113_p6 = scmp.lt.u32.totalorder %s2104_s7, %s2860_s20 }
  0xd2   : > { %p2107_p7 = pnand %p3410_p13, %p2105_p3 }
  0xd3   : > { %p2112_p1 = por %p2111_p2, %p2110_p4 }
  0xd4   : > { %p2108_p5 = pneg %p2107_p7 }
  0xd5   : > { %p2114_p12 = por %p2113_p6, %p2112_p1 }
  0xd7   : > { %p2115_p9 = pnand %p2114_p12, %p2108_p5 }
  0xd9   : > { %2118 = shalt.err (!%p2115_p9)
}
  0xda   : > { %s2119_s3 = scalar_lea.vmem %s2868_s17, 64  ;;  %s2421_s6 = smov [#allocation5]  }
  0xdb   : > { %p2120_p3 = scmp.ne.s32.totalorder %s2868_s17, %s2119_s3  ;;  %s2124_s23 = sshll.u32 %s2421_s6, 4  ;;  %s2125_s23 = int_to_ptr.vmem [resolvable:$false] %s2124_s23 }
  0xdc   : > { %s2126_s2 = scalar_lea.vmem %s2125_s23, 128  ;;  %p2127_p11 = scmp.lt.s32.totalorder %s2868_s17, %s2125_s23 }
  0xdd   : > { %p2122_p7 = pnand %p2120_p3, %p3410_p13  ;;  %p2128_p4 = scmp.lt.s32.totalorder %s2126_s2, %s2119_s3 }
  0xdf   : > { %p2123_p10 = pneg %p2122_p7  ;;  %p2129_p2 = por %p2128_p4, %p2127_p11 }
  0xe1   : > { %p2130_p1 = pnand %p2129_p2, %p2123_p10 }
  0xe3   : > { %2133 = shalt.err (!%p2130_p1)
}
  0xe4   : > { %1775 = dma.hbm_to_vmem [thread:$0]  (!%p2864_p0), %s2860_s20, 64, %s2868_s17, %s312_s4  }
  0xe5   : > { %s97_s7 = sld [smem:[#allocation4 + %s2412_s12]]  ;;  %p109_p11 = scmp.ne.s32.totalorder %s2384_s26, %s2380_s25 }
  0xe6   : > { %s98_s3 = sld [smem:[#allocation4 + %s2600_s18]]  ;;  %p115_p10 = scmp.ne.s32.totalorder %s2380_s25, %s2376_s24 }
  0xe7   : > { %s353_s13 = sand.u32 1, %s2384_s26   ;;  %p3478_p5 = scmp.eq.s32.totalorder %s2412_s12, 0 }
  0xe8   : > { %s1574_s6 = sshll.u32 %s353_s13, 4  ;;  %p3480_p12 = scmp.eq.s32.totalorder %s2581_s15, 0 }
  0xe9   : > { %p2905_p6 = por %p109_p11, %p3478_p5  ;;  %s3483_s20 = sld [smem:[#allocation38_spill]] }
  0xea   : > { %p2911_p9 = por %p115_p10, %p3480_p12  ;;  %s3484_s24 = sld [smem:[#allocation39_spill]] }
  0xeb   : > { %s1743_s17 = scalar_select %p2905_p6, [#allocation4], [#allocation21] }
  0xec   : > { %s3481_s4 = scalar_select %p2911_p9, 1, 0 }
  0xed   : > { %s3485_s23 = sld [smem:[#allocation37_spill]]  ;;  %s99_s2 = ssub.s32 %s97_s7, %s98_s3 }
  0xee   : > { %3482 = sst [smem:[#allocation53_spill]] %s3481_s4  ;;  %s102_s1 = sadd.s32 1, %s2384_s26 }
  0xef   : > { %p100_p3 = scmp.eq.s32.totalorder %s99_s2, 0  ;;  %s355_s11 = scalar_lea.vmem [#allocation10], %s1574_s6 }
  0xf0   : > { %s363_s19 = sshll.u32 %s355_s11, 4  ;;  %p3487_p7 = scmp.lt.s32.totalorder %s2412_s12, 2  ;;  %s2939_s19 = int_to_ptr.vmem [resolvable:$true] %s363_s19 }
  0xf1   : > { %s1744_s13 = scalar_select %p2905_p6, %s2412_s12, 0 }
  0xf2   : > { %s2922_s30 = scalar_select %p100_p3, %s2384_s26, %s102_s1  }
  0xf3   : > { %s3560_s17 = smov (!%p3487_p7, %s1743_s17), [#allocation25]  ;;  %p3488_p4 = pmov %p3487_p7 }
  0xf4   : > { %3486 = sst [smem:[#allocation54_spill]] %s2922_s30  ;;  %p165_p11 = scmp.ne.s32.totalorder %s3484_s24, %s3483_s20 }
  0xf5   : > { %s3562_s13 = smov (!%p3488_p4, %s1744_s13), 0  ;;  %p3489_p2 = pmov %p3488_p4 }
  0xf6   : > { %s356_s7 = sld [smem:[%s3560_s17 + %s3562_s13]] }
  0xf7   : > { %p2932_p1 = pnand %p3489_p2, %p2905_p6  ;;  %s2937_s3 = sld [smem:[#allocation4 + %s2412_s12]] }
  0xf8   : > { %s2942_s11 = sld [smem:[#allocation4 + %s2600_s18]]  ;;  %p2956_p6 = por %p165_p11, %p3478_p5 }
  0xf9   : > { %s3491_s30 = sld [smem:[#allocation57_spill]]  ;;  %p2136_p3 = pneg %p2932_p1 }
  0xfc   : > { %s1621_s1 = sshll.u32 %s356_s7, 8 }
  0xff   : > { %s3492_s4 = smov %s3491_s30  ;;  %s2952_s26 = scalar_lea.hbm %s3491_s30, %s1621_s1 }
 0x100   : > { %s2134_s13 = scalar_lea.hbm %s2952_s26, 256  ;;  %s2139_s1 = scalar_lea.hbm %s3492_s4, 768 }
 0x101   : > { %p2135_p12 = scmp.ne.s32.totalorder %s2952_s26, %s2134_s13  ;;  %p2140_p2 = scmp.lt.u32.totalorder %s2952_s26, %s3492_s4 }
 0x102   : > { %p2141_p11 = scmp.lt.u32.totalorder %s2139_s1, %s2134_s13  ;;  %p2143_p13 = scmp.lt.u32.totalorder %s2134_s13, %s2952_s26 }
 0x103   : > { %p2137_p7 = pnand %p2136_p3, %p2135_p12 }
 0x104   : > { %p2142_p5 = por %p2141_p11, %p2140_p2 }
 0x105   : > { %p2138_p4 = pneg %p2137_p7 }
 0x106   : > { %p2144_p10 = por %p2143_p13, %p2142_p5 }
 0x108   : > { %p2145_p9 = pnand %p2144_p10, %p2138_p4 }
 0x10a   : > { %2148 = shalt.err (!%p2145_p9)
}
 0x10b   : > { %s2149_s6 = scalar_lea.vmem %s2939_s19, 256  ;;  %s2422_s7 = smov [#allocation10]  }
 0x10c   : > { %p2150_p12 = scmp.ne.s32.totalorder %s2939_s19, %s2149_s6  ;;  %s2154_s30 = sshll.u32 %s2422_s7, 4  ;;  %s2155_s30 = int_to_ptr.vmem [resolvable:$false] %s2154_s30 }
 0x10d   : > { %s2156_s2 = scalar_lea.vmem %s2155_s30, 512  ;;  %p2157_p0 = scmp.lt.s32.totalorder %s2939_s19, %s2155_s30 }
 0x10e   : > { %p2152_p7 = pnand %p2150_p12, %p2136_p3  ;;  %p2158_p2 = scmp.lt.s32.totalorder %s2156_s2, %s2149_s6 }
 0x110   : > { %p2153_p8 = pneg %p2152_p7  ;;  %p2159_p11 = por %p2158_p2, %p2157_p0 }
 0x112   : > { %p2160_p13 = pnand %p2159_p11, %p2153_p8 }
 0x114   : > { %2163 = shalt.err (!%p2160_p13)
}
 0x115   : > { %1785 = dma.hbm_to_vmem [thread:$0]  (!%p2932_p1), %s2952_s26, 256, %s2939_s19, %s2690_s28, %s3466_s16, %s3466_s16, %s3465_s5  }
 0x116   : > { %p3494_p8 = scmp.eq.s32.totalorder %s2581_s15, 0  ;;  %p3495_p0 = scmp.ne.s32.totalorder %s3483_s20, %s3485_s23 }
 0x117   : > { %s3497_s6 = sand.u32 1, %s3484_s24   ;;  %s155_s1 = ssub.s32 %s2937_s3, %s2942_s11 }
 0x118   : > { %p2994_p9 = por %p3495_p0, %p3494_p8  ;;  %s1580_s13 = sshll.u32 %s3497_s6, 4 }
 0x119   : > { %s158_s8 = sadd.s32 1, %s3484_s24  ;;  %p156_p10 = scmp.eq.s32.totalorder %s155_s1, 0 }
 0x11a   : > { %s3496_s0 = scalar_select %p2994_p9, 1, 0 }
 0x11b   : > { %s1749_s7 = scalar_select %p2956_p6, [#allocation4], [#allocation23] }
 0x11c   : > { %s3564_s24 = smov (!%p156_p10, %s3484_s24), %s158_s8  ;;  %p3498_p1 = scmp.lt.s32.totalorder %s2412_s12, 2 }
 0x11d   : > { %s1750_s26 = scalar_select %p2956_p6, %s2412_s12, 0 }
 0x11e   : > { %s3566_s7 = smov (!%p3498_p1, %s1749_s7), [#allocation27]  ;;  %p3499_p3 = pmov %p3498_p1 }
 0x11f   : > { %s399_s28 = scalar_lea.vmem [#allocation13], %s1580_s13  ;;  %p3500_p4 = pmov %p3498_p1 }
 0x120   : > { %s3568_s26 = smov (!%p3499_p3, %s1750_s26), 0  ;;  %s3015_s19 = sshll.u32 %s399_s28, 4  ;;  %s3055_s19 = int_to_ptr.vmem [resolvable:$true] %s3015_s19 }
 0x121   : > { %p3021_p5 = pnand %p3500_p4, %p2956_p6  ;;  %s3025_s23 = sld [smem:[%s3566_s7 + %s3568_s26]] }
 0x122   : > { %s1583_s3 = sshll.u32 %s2412_s12, 4  ;;  %s420_s11 = scalar_lea.vmem [#allocation17], %s2845_s21 }
 0x123   : > { %s3501_s20 = scalar_select %p3021_p5, 1, 0 }
 0x124   : > { %s427_s30 = sshll.u32 %s420_s11, 4  ;;  %s3502_s1 = sld [smem:[#allocation62_spill]]  ;;  %s428_s30 = int_to_ptr.vmem [resolvable:$true] %s427_s30 }
 0x125   : > { %s418_s17 = scalar_lea.sflag [#allocation18], %s2845_s21  ;;  %p3503_p12 = scmp.ne.s32.totalorder %s3477_s27, 0 }
 0x127   : > { %p3504_p7 = pneg %p3503_p12 }
 0x12a   : > { %s3032_s8 = scalar_lea.hbm %s3502_s1, %s1583_s3  ;;  %s2169_s28 = scalar_lea.hbm %s3502_s1, 32 }
 0x12b   : > { %s2164_s13 = scalar_lea.hbm %s3032_s8, 16  ;;  %p2170_p13 = scmp.lt.u32.totalorder %s3032_s8, %s3502_s1 }
 0x12c   : > { %p2165_p6 = scmp.ne.s32.totalorder %s3032_s8, %s2164_s13  ;;  %p2171_p8 = scmp.lt.u32.totalorder %s2169_s28, %s2164_s13 }
 0x12d   : > { %p2173_p10 = scmp.lt.u32.totalorder %s2164_s13, %s3032_s8 }
 0x12e   : > { %p2167_p2 = pnand %p2165_p6, %p3504_p7  ;;  %p2172_p0 = por %p2171_p8, %p2170_p13 }
 0x130   : > { %p2168_p11 = pneg %p2167_p2  ;;  %p2174_p1 = por %p2173_p10, %p2172_p0 }
 0x132   : > { %p2175_p3 = pnand %p2174_p1, %p2168_p11 }
 0x134   : > { %2178 = shalt.err (!%p2175_p3)
}
 0x135   : > { %s2179_s21 = scalar_lea.vmem %s428_s30, 16  ;;  %p3505_p6 = pmov %p3504_p7 }
 0x136   : > { %p2180_p4 = scmp.ne.s32.totalorder %s428_s30, %s2179_s21  ;;  %s2423_s3 = smov [#allocation17]  }
 0x137   : > { %s2184_s6 = sshll.u32 %s2423_s3, 4  ;;  %s2185_s6 = int_to_ptr.vmem [resolvable:$false] %s2184_s6 }
 0x138   : > { %p2182_p7 = pnand %p2180_p4, %p3505_p6  ;;  %s2186_s7 = scalar_lea.vmem %s2185_s6, 32 }
 0x139   : > { %p2187_p9 = scmp.lt.s32.totalorder %s428_s30, %s2185_s6  ;;  %p2188_p5 = scmp.lt.s32.totalorder %s2186_s7, %s2179_s21 }
 0x13a   : > { %p2183_p2 = pneg %p2182_p7 }
 0x13b   : > { %p2189_p8 = por %p2188_p5, %p2187_p9 }
 0x13d   : > { %p2190_p13 = pnand %p2189_p8, %p2183_p2 }
 0x13f   : > { %2193 = shalt.err (!%p2190_p13)
}
 0x140   : > { %1798 = dma.hbm_to_vmem [thread:$0]  (!%p3503_p12), %s3032_s8, 16, %s428_s30, %s418_s17  }
 0x141   : > { %s1623_s13 = sshll.u32 %s3025_s23, 8  ;;  %s3506_s11 = sld [smem:[#allocation59_spill]] }
 0x142   : > { %p3508_p5 = scmp.ne.s32.totalorder %s3501_s20, 0 }
 0x144   : > { %p2196_p11 = pneg %p3508_p5 }
 0x147   : > { %s3507_s2 = smov %s3506_s11  ;;  %s3061_s3 = scalar_lea.hbm %s3506_s11, %s1623_s13 }
 0x148   : > { %s2194_s21 = scalar_lea.hbm %s3061_s3, 256  ;;  %s2199_s23 = scalar_lea.hbm %s3507_s2, 768 }
 0x149   : > { %p2195_p9 = scmp.ne.s32.totalorder %s3061_s3, %s2194_s21  ;;  %p2200_p10 = scmp.lt.u32.totalorder %s3061_s3, %s3507_s2 }
 0x14a   : > { %p2201_p1 = scmp.lt.u32.totalorder %s2199_s23, %s2194_s21  ;;  %p2203_p4 = scmp.lt.u32.totalorder %s2194_s21, %s3061_s3 }
 0x14b   : > { %p2197_p0 = pnand %p2196_p11, %p2195_p9 }
 0x14c   : > { %p2202_p3 = por %p2201_p1, %p2200_p10 }
 0x14d   : > { %p2198_p12 = pneg %p2197_p0 }
 0x14e   : > { %p2204_p6 = por %p2203_p4, %p2202_p3 }
 0x150   : > { %p2205_p7 = pnand %p2204_p6, %p2198_p12 }
 0x152   : > { %2208 = shalt.err (!%p2205_p7)
}
 0x153   : > { %s2209_s6 = scalar_lea.vmem %s3055_s19, 256  ;;  %s2424_s7 = smov [#allocation13]  }
 0x154   : > { %p2210_p2 = scmp.ne.s32.totalorder %s3055_s19, %s2209_s6  ;;  %s2214_s13 = sshll.u32 %s2424_s7, 4  ;;  %s2215_s13 = int_to_ptr.vmem [resolvable:$false] %s2214_s13 }
 0x155   : > { %s2216_s26 = scalar_lea.vmem %s2215_s13, 512  ;;  %p2217_p9 = scmp.lt.s32.totalorder %s3055_s19, %s2215_s13 }
 0x156   : > { %p2212_p8 = pnand %p2210_p2, %p2196_p11  ;;  %p2218_p0 = scmp.lt.s32.totalorder %s2216_s26, %s2209_s6 }
 0x158   : > { %p2213_p13 = pneg %p2212_p8  ;;  %p2219_p10 = por %p2218_p0, %p2217_p9 }
 0x15a   : > { %p2220_p1 = pnand %p2219_p10, %p2213_p13 }
 0x15c   : > { %2223 = shalt.err (!%p2220_p1)
}
 0x15d   : > { %1795 = dma.hbm_to_vmem [thread:$0]  (!%p3508_p5), %s3061_s3, 256, %s3055_s19, %s2793_s14, %s3466_s16, %s3466_s16, %s3465_s5  }
 0x15e   : > { %s3509_s28 = sld [smem:[#allocation46_spill]] }
 0x164   : > { %p3510_p11 = scmp.ne.s32.totalorder %s3509_s28, 0 }
 0x165   : > { %s3095_s11 = sand.u32 (!%p3510_p11), 1, %s2404_s10   ;;  %p3511_p12 = scmp.ne.s32.totalorder (!%p3510_p11), %s3470_s9, 0 }
 0x166   : > { %436 = sbr.rel (%p3510_p11) target bundleno = 1987 (0x7c3), region = 52  ;;  %s1585_s21 = sshll.u32 (!%p3510_p11), %s3095_s11, 2 }
 0x167   : > { %s439_s27 = scalar_lea.sflag (!%p3510_p11), [#allocation6], %s3095_s11  ;;  %s3099_s30 = scalar_lea.vmem (!%p3510_p11), [#allocation5], %s1585_s21 }
 0x16d   : > { %2319 = dma.done.wait (%p3511_p12), %s439_s27, 64  }
 0x16e   : > { %2321 = vsyncadd (%p3511_p12), %s439_s27, 4294967232  ;;  %s3512_s14 = sld [smem:[#allocation42_spill]]  ;;  %s3513_s5 = sld [smem:[#allocation47_spill]] }
 0x16f   : > { %s447_s16 = sand.u32 1, %s2581_s15  }
 0x170   : > { %s448_s3 = scalar_lea.sflag [#allocation9], %s447_s16 }
 0x174   : > { %s449_s19 = sand.u32 1, %s3512_s14   ;;  %p3514_p5 = scmp.ne.s32.totalorder %s3513_s5, 0 }
 0x175   : > { %s3107_s20 = sshll.u32 %s449_s19, 4 }
 0x176   : > { %s451_s23 = scalar_lea.vmem [#allocation8], %s3107_s20 }
 0x177   : > { %2323 = dma.done.wait (%p3514_p5), %s448_s3, 256  }
 0x178   : > { %2325 = vsyncadd (%p3514_p5), %s448_s3, 4294967040  ;;  %s3515_s8 = sld [smem:[#allocation53_spill]]  ;;  %s458_s17 = sand.u32 1, %s2380_s25  }
 0x179   : > { %s3115_s6 = sshll.u32 %s458_s17, 4 }
 0x17a   : > { %s460_s7 = scalar_lea.vmem [#allocation10], %s3115_s6 }
 0x17e   : > { %p3516_p3 = scmp.ne.s32.totalorder %s3515_s8, 0 }
 0x180   : > { %2327 = dma.done.wait (%p3516_p3), %s448_s3, 256  }
 0x181   : > { %2329 = vsyncadd (%p3516_p3), %s448_s3, 4294967040  ;;  %s467_s13 = sand.u32 1, %s2368_s22   ;;  %s466_s28 = scalar_lea.sflag [#allocation12], %s447_s16 }
 0x182   : > { %s3123_s26 = sshll.u32 %s467_s13, 4  ;;  %p3517_p4 = scmp.ne.s32.totalorder %s3453_s29, 0 }
 0x183   : > { %s469_s21 = scalar_lea.vmem [#allocation11], %s3123_s26 }
 0x184   : > { %2331 = dma.done.wait (%p3517_p4), %s466_s28, 256  }
 0x185   : > { %2333 = vsyncadd (%p3517_p4), %s466_s28, 4294967040  ;;  %s3518_s27 = sld [smem:[#allocation38_spill]]  ;;  %p3519_p6 = scmp.ne.s32.totalorder %s3496_s0, 0 }
 0x18b   : > { %s476_s14 = sand.u32 1, %s3518_s27  }
 0x18c   : > { %s3131_s5 = sshll.u32 %s476_s14, 4 }
 0x18d   : > { %s478_s19 = scalar_lea.vmem [#allocation13], %s3131_s5 }
 0x18e   : > { %2335 = dma.done.wait (%p3519_p6), %s466_s28, 256  }
 0x18f   : > { %2337 = vsyncadd (%p3519_p6), %s466_s28, 4294967040  ;;  %p3520_p7 = scmp.eq.s32.totalorder %s2581_s15, 0 }
 0x191   : > { %2339 = dma.done.wait (%p3520_p7), [#allocation15], 256   ;;  %p3521_p2 = pmov %p3520_p7 }
 0x192   : > { %s492_s29 = scalar_lea.sflag [#allocation18], %s3095_s11 }
 0x193   : > { %2341 = vsyncadd (%p3521_p2), [#allocation15], 4294967040 }
 0x194   : > { %2343 = dma.done.wait (%p3511_p12), %s492_s29, 16  }
 0x195   : > { %2345 = vsyncadd (%p3511_p12), %s492_s29, 4294967280  ;;  %v2425_v0 = vmov 0.0   ;;  %vm2426_vm0 = vmmov 0   ;;  %v1954_v1 = vld [vmem:[%s460_s7] sm:$0xff]   ;;  %v1956_v3 = vld [vmem:[%s460_s7 + $0x8] sm:$0xff]   ;;  %vm585_vm1 = vcmask 261120   ;;  %v765_v21 = vlaneseq }
 0x196   : > { %1663 = vmatprep.subr.bf16.mxu1 %v2425_v0  ;;  %1655 = vmatprep.subr.bf16.mxu0 %v2425_v0  ;;  %v1955_v2 = vld [vmem:[%s451_s23] sm:$0xff]   ;;  %v1957_v4 = vld [vmem:[%s451_s23 + $0x8] sm:$0xff]   ;;  %s2427_s9 = smov 8   ;;  %s2428_s0 = smov 16   ;;  %vm745_vm2 = vcmask 64512   ;;  %vm747_vm3 = vcmask 130048  }
 0x197   : > { %1667 = vmatprep.mubr.msk.bf16.mxu1 %vm2426_vm0, %v2425_v0  ;;  %1659 = vmatprep.mubr.msk.bf16.mxu0 %vm2426_vm0, %v2425_v0  ;;  %v3160_v5 = vld [vmem:[%s3099_s30] sm:$0xf]  ;;  %v734_v6 = vld [vmem:[#allocation14] sm:$0xff]  ;;  %v751_v7 = vld [vmem:[#allocation16] sm:$0xff]  ;;  %s2429_s30 = smov 24   ;;  %s2430_s16 = smov 31  }
 0x198   : > { %1664 = vmatpush3.bf16.msra.mxu1 %v1954_v1  ;;  %1656 = vmatpush3.bf16.msra.mxu0 %v1955_v2  ;;  %s2431_s20 = smov 127   ;;  %s2432_s3 = smov 1   ;;  %v3179_v22 = vand.u32 127, %v765_v21  ;;  %vm749_vm4 = vcmask 195584   ;;  %vm787_vm5 = vcmask 252928   ;;  %vm795_vm6 = vcmask 7168  }
 0x199   : > { %1665 = vmatprep.subr.bf16.mxu1 %v2425_v0  ;;  %1657 = vmatprep.subr.bf16.mxu0 %v2425_v0  ;;  %s2433_s23 = smov 97   ;;  %s2434_s8 = smov 120   ;;  %v1958_v56 = vld [vmem:[%s469_s21] sm:$0xff]   ;;  %v1959_v57 = vld [vmem:[%s469_s21 + $0x8] sm:$0xff]   ;;  %vm888_vm9 = vcmask 1043456   ;;  %vm933_vm10 = vcmask 60416  }
 0x19a   : > { %736 = vrot.lane.b32.xlu0 %v734_v6, %s2427_s9  ;;  %739 = vrot.lane.b32.xlu1 %v734_v6, %s2428_s0  ;;  %v771_v26 = vand.u32 1, %v3179_v22  ;;  %s2435_s17 = smov 112   ;;  %s2436_s6 = smov 104   ;;  %vm1056_vm11 = vcmask 126016   ;;  %vm1176_vm12 = vcmask 191616   ;;  %vm1296_vm13 = vcmask 257216  }
 0x19b   : > { %s3524_s7 = sld [smem:[#allocation51_spill]]  ;;  %s1592_s13 = sshll.u32 %s3095_s11, 3 }
 0x19c   : > { %1666 = vmatpush3.bf16.msra.mxu1 %v1956_v3  ;;  %1658 = vmatpush3.bf16.msra.mxu0 %v1957_v4  ;;  %vm3184_vm7 = vcmp.eq.s32.totalorder %v771_v26, 0  ;;  %v821_v4 = vshrl.u32 %v765_v21, 7  ;;  %s1617_s26 = sshll.u32 %s2581_s15, 7  ;;  %s550_s28 = scalar_lea.vmem [#allocation19], %s1592_s13 }
 0x19d   : > { %1679 = vmatprep.subr.bf16.mxu1 %v2425_v0  ;;  %1671 = vmatprep.subr.bf16.mxu0 %v2425_v0  ;;  %s1369_s21 = sshll.u32 %s550_s28, 4  ;;  %s3525_s5 = sld [smem:[#allocation63_spill]]  ;;  %s3286_s21 = int_to_ptr.vmem [resolvable:$true] %s1369_s21 }
 0x19e   : > { %753 = vrot.lane.b32.xlu0 %v751_v7, %s2427_s9  ;;  %756 = vrot.lane.b32.xlu1 %v751_v7, %s2428_s0  ;;  %vm822_vm8 = vcmp.gt.s32.totalorder %v3179_v22, %v821_v4  ;;  %s1356_s29 = scalar_lea.sflag [#allocation7], %s3095_s11  ;;  %s2437_s15 = smov [#allocation19]  }
 0x19f   : > { %1668 = vmatmul.mubr.msk.bf16.vlgmr.msra.gmra.mrb[0].mxu1 %vm585_vm1, %v3160_v5  ;;  %1660 = vmatmul.mubr.msk.bf16.vlgmr.msra.gmra.mrb[0].mxu0 %vm585_vm1, %v3160_v5 }
 0x1a0   : > { %1681 = vmatprep.mubr.msk.bf16.mxu1 %vm2426_vm0, %v2425_v0  ;;  %1675 = vmatprep.mubr.msk.bf16.mxu0 %vm2426_vm0, %v2425_v0 }
 0x1a1   : > { %1672 = vmatpush3.bf16.msra.mxu0 %v1958_v56  ;;  %p3526_p13 = scmp.ne.s32.totalorder %s3524_s7, 0 }
 0x1a2   : > { %742 = vrot.lane.b32.xlu0 %v734_v6, %s2429_s30  ;;  %759 = vrot.lane.b32.xlu1 %v751_v7, %s2429_s30 }
 0x1a3   : > { %1673 = vmatprep.subr.bf16.mxu0 %v2425_v0 }
 0x1a5   : > { %1674 = vmatpush3.bf16.msra.mxu0 %v1959_v57 }
 0x1a6   : > { %1685 = vmatprep.subr.bf16.mxu0 %v2425_v0 }
 0x1a8   : > { %1676 = vmatmul.mubr.msk.bf16.vlgmr.msra.gmra.mrb[4].mxu0 %vm585_vm1, %v3160_v5 }
 0x1a9   : > { %1687 = vmatprep.mubr.msk.bf16.mxu0 %vm2426_vm0, %v2425_v0 }
 0x20c   : > { %v737_v17 = vpop.permute.xlu0 %736  ;;  %v740_v18 = vpop.permute.xlu1 %739 }
 0x20d   : > { %v746_v25 = vsel %vm745_vm2, %v734_v6, %v737_v17 }
 0x20e   : > { %v748_v30 = vsel %vm747_vm3, %v746_v25, %v740_v18 }
 0x210   : > { %v754_v19 = vpop.permute.xlu0 %753  ;;  %v757_v20 = vpop.permute.xlu1 %756 }
 0x211   : > { %v762_v27 = vsel %vm745_vm2, %v751_v7, %v754_v19 }
 0x212   : > { %v763_v31 = vsel %vm747_vm3, %v762_v27, %v757_v20 }
 0x214   : > { %v743_v23 = vpop.permute.xlu0 %742  ;;  %v760_v24 = vpop.permute.xlu1 %759 }
 0x215   : > { %v750_v33 = vsel %vm749_vm4, %v748_v30, %v743_v23  ;;  %v764_v38 = vsel %vm749_vm4, %v763_v31, %v760_v24 }
 0x272   : > { %v676_v8 = vpop.f32.mrb[0].mxu1  ;;  %v623_v10 = vpop.f32.mrb[0].mxu0 }
 0x273   : > { %805 = vrot.lane.b32.xlu1 %v676_v8, %s2430_s16  ;;  %802 = vrot.lane.b32.xlu0 %v676_v8, %s2431_s20  ;;  %v1669_v9 = vpop.f32.mrb[1].mxu1  ;;  %v1661_v12 = vpop.f32.mrb[1].mxu0  ;;  %v629_v16 = vmul.f32 0.35355338, %v623_v10  ;;  %v817_v40 = vmul.f32 %v750_v33, %v676_v8 }
 0x274   : > { %v679_v11 = vpop.f32.mrb[2].mxu1  ;;  %v626_v14 = vpop.f32.mrb[2].mxu0 }
 0x275   : > { %v1670_v13 = vpop.f32.mrb[3].mxu1  ;;  %v1662_v15 = vpop.f32.mrb[3].mxu0  ;;  %v798_v52 = vmul.f32 %v750_v33, %v629_v16 }
 0x277   : > { %812 = vrot.lane.b32.xlu1 %v676_v8, %s2432_s3  ;;  %809 = vrot.lane.b32.xlu0 %v676_v8, %s2433_s23 }
 0x27b   : > { %784 = vrot.lane.b32.xlu1 %v629_v16, %s2430_s16  ;;  %781 = vrot.lane.b32.xlu0 %v629_v16, %s2431_s20  ;;  %v728_v11 = vpop.f32.mrb[4].mxu0 }
 0x27c   : > { %v825_v12 = vpack.c.bf16 %v728_v11, %v728_v11  ;;  %v1677_v13 = vpop.f32.mrb[5].mxu0 }
 0x27d   : > { %v731_v14 = vpop.f32.mrb[6].mxu0 }
 0x27e   : > { %v1678_v15 = vpop.f32.mrb[7].mxu0 }
 0x27f   : > { %792 = vrot.lane.b32.xlu1 %v629_v16, %s2432_s3  ;;  %789 = vrot.lane.b32.xlu0 %v629_v16, %s2433_s23  ;;  %v890_v16 = vsel %vm888_vm9, %v825_v12, 0 }
 0x280   : > { %1686 = vmatpush3.bf16.msra.mxu0 %v890_v16 }
 0x281   : > { %1697 = vmatprep.subr.bf16.mxu0 %v2425_v0 }
 0x2e5   : > { %v806_v28 = vpop.permute.xlu1 %805  ;;  %v803_v29 = vpop.permute.xlu0 %802 }
 0x2e6   : > { %v808_v36 = vsel %vm787_vm5, %v803_v29, %v806_v28 }
 0x2e9   : > { %v813_v34 = vpop.permute.xlu1 %812  ;;  %v810_v35 = vpop.permute.xlu0 %809 }
 0x2ea   : > { %v815_v37 = vsel %vm795_vm6, %v810_v35, %v813_v34 }
 0x2eb   : > { %v816_v39 = vsel %vm3184_vm7, %v808_v36, %v815_v37 }
 0x2ec   : > { %v818_v41 = vmul.f32 %v816_v39, %v764_v38 }
 0x2ed   : > { %v785_v42 = vpop.permute.xlu1 %784  ;;  %v782_v43 = vpop.permute.xlu0 %781 }
 0x2ee   : > { %v819_v44 = vadd.f32 %v818_v41, %v817_v40  ;;  %v788_v48 = vsel %vm787_vm5, %v782_v43, %v785_v42 }
 0x2f0   : > { %v824_v45 = vpack.c.bf16 %v819_v44, %v819_v44 }
 0x2f1   : > { %v793_v46 = vpop.permute.xlu1 %792  ;;  %v790_v47 = vpop.permute.xlu0 %789 }
 0x2f2   : > { %v796_v49 = vsel %vm795_vm6, %v790_v47, %v793_v46  ;;  %939 = vrot.lane.b32.xlu0 %v824_v45, %s2434_s8  ;;  %v830_v50 = vsel %vm745_vm2, %v824_v45, 0 }
 0x2f3   : > { %v797_v51 = vsel %vm3184_vm7, %v788_v48, %v796_v49  ;;  %1680 = vmatpush3.bf16.xpose.msra.mxu1 %v830_v50 }
 0x2f4   : > { %v799_v53 = vmul.f32 %v797_v51, %v764_v38  ;;  %1691 = vmatprep.subr.bf16.mxu1 %v2425_v0 }
 0x2f6   : > { %v800_v54 = vadd.f32 %v799_v53, %v798_v52  ;;  %1060 = vrot.lane.b32.xlu0 %v824_v45, %s2435_s17 }
 0x2f8   : > { %v823_v55 = vpack.c.bf16 %v800_v54, %v800_v54 }
 0x2fa   : > { %1180 = vrot.lane.b32.xlu0 %v824_v45, %s2436_s6  ;;  %936 = vrot.lane.b32.xlu1 %v823_v55, %s2434_s8 }
 0x2fb   : > { %1682 = vmatmul.mubr.msk.bf16.vlgmr.msra.gmra.mrb[4].mxu1 %vm745_vm2, %v823_v55 }
 0x2fc   : > { %1693 = vmatprep.mubr.msk.bf16.mxu1 %vm2426_vm0, %v2425_v0 }
 0x2fe   : > { %1058 = vrot.lane.b32.xlu1 %v823_v55, %s2435_s17 }
 0x302   : > { %1178 = vrot.lane.b32.xlu1 %v823_v55, %s2436_s6 }
 0x364   : > { %v940_v58 = vpop.permute.xlu0 %939 }
 0x365   : > { %v945_v59 = vsel %vm745_vm2, %v940_v58, 0 }
 0x366   : > { %1692 = vmatpush3.bf16.xpose.msra.mxu1 %v945_v59 }
 0x367   : > { %1703 = vmatprep.subr.bf16.mxu1 %v2425_v0 }
 0x368   : > { %v1061_v60 = vpop.permute.xlu0 %1060 }
 0x369   : > { %v1066_v62 = vsel %vm745_vm2, %v1061_v60, 0 }
 0x36c   : > { %v937_v61 = vpop.permute.xlu1 %936  ;;  %v1181_v63 = vpop.permute.xlu0 %1180 }
 0x36d   : > { %1694 = vmatmul.mubr.msk.bf16.vlgmr.msra.gmra.mrb[8].mxu1 %vm745_vm2, %v937_v61  ;;  %v1186_v2 = vsel %vm745_vm2, %v1181_v63, 0 }
 0x36e   : > { %1704 = vmatpush3.bf16.xpose.msra.mxu1 %v1066_v62  ;;  %1705 = vmatprep.mubr.msk.bf16.mxu1 %vm2426_vm0, %v2425_v0 }
 0x36f   : > { %1715 = vmatprep.subr.bf16.mxu1 %v2425_v0 }
 0x370   : > { %v1059_v1 = vpop.permute.xlu1 %1058 }
 0x374   : > { %v1179_v3 = vpop.permute.xlu1 %1178 }
 0x375   : > { %1706 = vmatmul.mubr.msk.bf16.vlgmr.msra.gmra.mrb[12].mxu1 %vm745_vm2, %v1059_v1 }
 0x376   : > { %1716 = vmatpush3.bf16.xpose.msra.mxu1 %v1186_v2  ;;  %1717 = vmatprep.mubr.msk.bf16.mxu1 %vm2426_vm0, %v2425_v0 }
 0x377   : > { %1727 = vmatprep.subr.bf16.mxu1 %v2425_v0 }
 0x37d   : > { %1718 = vmatmul.mubr.msk.bf16.vlgmr.msra.gmra.mrb[16].mxu1 %vm745_vm2, %v1179_v3 }
 0x37e   : > { %1731 = vmatprep.mubr.msk.bf16.mxu1 %vm2426_vm0, %v2425_v0 }
 0x3ce   : > { %v866_v5 = vpop.f32.mrb[4].mxu1 }
 0x3cf   : > { %v872_v6 = vsel %vm822_vm8, %v866_v5, -inf  ;;  %v1683_v7 = vpop.f32.mrb[5].mxu1 }
 0x3d0   : > { %v869_v8 = vpop.f32.mrb[6].mxu1  ;;  %v873_v9 = vsel %vm745_vm2, %v872_v6, -inf }
 0x3d1   : > { %874 = vmax.xlane.f32.xlu0 %v873_v9  ;;  %v1684_v10 = vpop.f32.mrb[7].mxu1 }
 0x440   : > { %v981_v17 = vpop.f32.mrb[8].mxu1 }
 0x441   : > { %v987_v18 = vsel %vm822_vm8, %v981_v17, -inf  ;;  %v1695_v19 = vpop.f32.mrb[9].mxu1 }
 0x442   : > { %v984_v20 = vpop.f32.mrb[10].mxu1  ;;  %v988_v21 = vsel %vm745_vm2, %v987_v18, -inf }
 0x443   : > { %989 = vmax.xlane.f32.xlu1 %v988_v21  ;;  %v1696_v23 = vpop.f32.mrb[11].mxu1 }
 0x448   : > { %v1102_v24 = vpop.f32.mrb[12].mxu1 }
 0x449   : > { %v1108_v25 = vsel %vm822_vm8, %v1102_v24, -inf  ;;  %v1707_v26 = vpop.f32.mrb[13].mxu1 }
 0x44a   : > { %v1105_v27 = vpop.f32.mrb[14].mxu1  ;;  %v1109_v28 = vsel %vm745_vm2, %v1108_v25, -inf }
 0x44b   : > { %1110 = vmax.xlane.f32.xlu0 %v1109_v28  ;;  %v1708_v29 = vpop.f32.mrb[15].mxu1  ;;  %v1961_v27 = vld [vmem:[%s478_s19 + $0x8] sm:$0xff]  }
 0x450   : > { %v1222_v30 = vpop.f32.mrb[16].mxu1 }
 0x451   : > { %v1228_v31 = vsel %vm822_vm8, %v1222_v30, -inf  ;;  %v1719_v32 = vpop.f32.mrb[17].mxu1 }
 0x452   : > { %v1225_v33 = vpop.f32.mrb[18].mxu1  ;;  %v1229_v34 = vsel %vm745_vm2, %v1228_v31, -inf }
 0x453   : > { %1230 = vmax.xlane.f32.xlu0 %v1229_v34  ;;  %v1720_v35 = vpop.f32.mrb[19].mxu1 }
 0x45e   : > { %v875_v36 = vpop.xlane.xlu0 %874 }
 0x45f   : > { %v876_v37 = vsub.f32 %v872_v6, %v875_v36 }
 0x461   : > { %v877_v38 = vmul.f32 1.442695, %v876_v37 }
 0x463   : > { %1962 = vpow2.f32 %v877_v38 }
 0x46d   : > { %v1963_v39 = vpop.eup %1962 }
 0x46e   : > { %v879_v40 = vsel %vm745_vm2, %v1963_v39, 0.0 }
 0x46f   : > { %880 = vadd.xlane.f32.xlu1 %v879_v40 }
 0x480   : > { %1001 = vrot.lane.b32.xlu1 %v825_v12, %s2434_s8 }
 0x4d0   : > { %v990_v41 = vpop.xlane.xlu1 %989 }
 0x4d1   : > { %v991_v42 = vsub.f32 %v987_v18, %v990_v41 }
 0x4d3   : > { %v992_v22 = vmul.f32 1.442695, %v991_v42 }
 0x4d5   : > { %1964 = vpow2.f32 %v992_v22 }
 0x4d8   : > { %v1111_v43 = vpop.xlane.xlu0 %1110 }
 0x4d9   : > { %v1112_v44 = vsub.f32 %v1108_v25, %v1111_v43  ;;  %v1960_v25 = vld [vmem:[%s478_s19] sm:$0xff]   ;;  %s3284_s19 = scalar_lea.hbm %s3525_s5, %s1617_s26 }
 0x4da   : > { %1728 = vmatpush3.bf16.msra.mxu1 %v1960_v25 }
 0x4db   : > { %v1113_v45 = vmul.f32 1.442695, %v1112_v44  ;;  %1729 = vmatprep.subr.bf16.mxu1 %v2425_v0 }
 0x4dd   : > { %1966 = vpow2.f32 %v1113_v45 }
 0x4de   : > { %1730 = vmatpush3.bf16.msra.mxu1 %v1961_v27 }
 0x4df   : > { %v1965_v46 = vpop.eup %1964 }
 0x4e0   : > { %v1231_v47 = vpop.xlane.xlu0 %1230  ;;  %v994_v48 = vsel %vm745_vm2, %v1965_v46, 0.0 }
 0x4e1   : > { %v1232_v49 = vsub.f32 %v1228_v31, %v1231_v47  ;;  %995 = vadd.xlane.f32.xlu0 %v994_v48 }
 0x4e3   : > { %v1233_v50 = vmul.f32 1.442695, %v1232_v49 }
 0x4e5   : > { %1968 = vpow2.f32 %v1233_v50 }
 0x4e7   : > { %v1967_v51 = vpop.eup %1966 }
 0x4e8   : > { %v1115_v52 = vsel %vm745_vm2, %v1967_v51, 0.0 }
 0x4e9   : > { %1116 = vadd.xlane.f32.xlu1 %v1115_v52 }
 0x4ef   : > { %v1969_v53 = vpop.eup %1968 }
 0x4f0   : > { %v1235_v54 = vsel %vm745_vm2, %v1969_v53, 0.0 }
 0x4f1   : > { %1236 = vadd.xlane.f32.xlu0 %v1235_v54 }
 0x4fa   : > { %1241 = vrot.lane.b32.xlu1 %v825_v12, %s2436_s6 }
 0x4fc   : > { %v881_v55 = vpop.xlane.xlu1 %880 }
 0x4fd   : > { %1970 = vrcp.f32 %v881_v55 }
 0x500   : > { %v1002_v57 = vpop.permute.xlu1 %1001 }
 0x501   : > { %v1007_v60 = vsel %vm888_vm9, %v1002_v57, 0 }
 0x507   : > { %v1971_v56 = vpop.eup %1970  ;;  %1121 = vrot.lane.b32.xlu0 %v825_v12, %s2435_s17 }
 0x508   : > { %v883_v58 = vmul.f32 %v1971_v56, %v1963_v39 }
 0x50a   : > { %v884_v59 = vpack.c.bf16 %v883_v58, %v883_v58 }
 0x50c   : > { %1688 = vmatmul.mubr.msk.bf16.vlgmr.msra.gmra.mrb[8].mxu0 %vm745_vm2, %v884_v59 }
 0x50d   : > { %1698 = vmatpush3.bf16.msra.mxu0 %v1007_v60  ;;  %1699 = vmatprep.mubr.msk.bf16.mxu0 %vm2426_vm0, %v2425_v0 }
 0x50e   : > { %1709 = vmatprep.subr.bf16.mxu0 %v2425_v0 }
 0x56e   : > { %v996_v61 = vpop.xlane.xlu0 %995 }
 0x56f   : > { %1972 = vrcp.f32 %v996_v61 }
 0x576   : > { %v1117_v62 = vpop.xlane.xlu1 %1116 }
 0x577   : > { %1974 = vrcp.f32 %v1117_v62 }
 0x579   : > { %v1973_v63 = vpop.eup %1972 }
 0x57a   : > { %v998_v1 = vmul.f32 %v1973_v63, %v1965_v46  ;;  %v1242_v8 = vpop.permute.xlu1 %1241 }
 0x57b   : > { %v1247_v10 = vsel %vm888_vm9, %v1242_v8, 0 }
 0x57c   : > { %v999_v2 = vpack.c.bf16 %v998_v1, %v998_v1 }
 0x57e   : > { %v1237_v3 = vpop.xlane.xlu0 %1236  ;;  %1700 = vmatmul.mubr.msk.bf16.vlgmr.msra.gmra.mrb[12].mxu0 %vm745_vm2, %v999_v2 }
 0x57f   : > { %1976 = vrcp.f32 %v1237_v3  ;;  %1711 = vmatprep.mubr.msk.bf16.mxu0 %vm2426_vm0, %v2425_v0 }
 0x581   : > { %v1975_v4 = vpop.eup %1974 }
 0x582   : > { %v1119_v5 = vmul.f32 %v1975_v4, %v1967_v51  ;;  %v1122_v6 = vpop.permute.xlu0 %1121 }
 0x583   : > { %v1127_v7 = vsel %vm888_vm9, %v1122_v6, 0 }
 0x584   : > { %1710 = vmatpush3.bf16.msra.mxu0 %v1127_v7  ;;  %v1120_v9 = vpack.c.bf16 %v1119_v5, %v1119_v5 }
 0x585   : > { %1721 = vmatprep.subr.bf16.mxu0 %v2425_v0 }
 0x587   : > { %1712 = vmatmul.mubr.msk.bf16.vlgmr.msra.gmra.mrb[16].mxu0 %vm745_vm2, %v1120_v9 }
 0x588   : > { %1722 = vmatpush3.bf16.msra.mxu0 %v1247_v10  ;;  %1723 = vmatprep.mubr.msk.bf16.mxu0 %vm2426_vm0, %v2425_v0 }
 0x589   : > { %v1977_v11 = vpop.eup %1976 }
 0x58a   : > { %v1239_v12 = vmul.f32 %v1977_v11, %v1969_v53 }
 0x58c   : > { %v1240_v13 = vpack.c.bf16 %v1239_v12, %v1239_v12 }
 0x58f   : > { %1724 = vmatmul.mubr.msk.bf16.vlgmr.msra.gmra.mrb[20].mxu0 %vm745_vm2, %v1240_v13 }
 0x5df   : > { %v926_v14 = vpop.f32.mrb[8].mxu0 }
 0x5e0   : > { %v932_v15 = vpack.c.bf16 %v926_v14, %v926_v14  ;;  %v1689_v16 = vpop.f32.mrb[9].mxu0 }
 0x5e1   : > { %v929_v17 = vpop.f32.mrb[10].mxu0 }
 0x5e2   : > { %934 = vst.msk [vmem:[#allocation2] sm:$0xf] %vm933_vm10, %v932_v15  ;;  %v1690_v18 = vpop.f32.mrb[11].mxu0 }
 0x651   : > { %v1043_v19 = vpop.f32.mrb[12].mxu0 }
 0x652   : > { %v1624_v20 = vpack.c.bf16 %v1043_v19, %v1043_v19  ;;  %v1701_v21 = vpop.f32.mrb[13].mxu0 }
 0x653   : > { %v1046_v23 = vpop.f32.mrb[14].mxu0 }
 0x654   : > { %1053 = vrot.lane.b32.xlu1 %v1624_v20, %s2427_s9  ;;  %v1702_v24 = vpop.f32.mrb[15].mxu0  ;;  %s2224_s9 = scalar_lea.vmem %s3286_s21, 128 }
 0x655   : > { %p2225_p8 = scmp.ne.s32.totalorder %s3286_s21, %s2224_s9 }
 0x657   : > { %p2226_p9 = pnand %p2225_p8, %p3526_p13 }
 0x659   : > { %p2227_p0 = pneg %p2226_p9 }
 0x65a   : > { %v1163_v26 = vpop.f32.mrb[16].mxu0 }
 0x65b   : > { %v1625_v28 = vpack.c.bf16 %v1163_v26, %v1163_v26  ;;  %v1713_v29 = vpop.f32.mrb[17].mxu0 }
 0x65c   : > { %v1166_v30 = vpop.f32.mrb[18].mxu0 }
 0x65d   : > { %1173 = vrot.lane.b32.xlu0 %v1625_v28, %s2428_s0  ;;  %v1714_v31 = vpop.f32.mrb[19].mxu0  ;;  %s2228_s0 = sshll.u32 %s2437_s15, 4  ;;  %s2229_s0 = int_to_ptr.vmem [resolvable:$false] %s2228_s0 }
 0x65e   : > { %p2231_p10 = scmp.lt.s32.totalorder %s3286_s21, %s2229_s0 }
 0x662   : > { %v1283_v32 = vpop.f32.mrb[20].mxu0 }
 0x663   : > { %v1626_v33 = vpack.c.bf16 %v1283_v32, %v1283_v32  ;;  %v1725_v34 = vpop.f32.mrb[21].mxu0 }
 0x664   : > { %v1286_v35 = vpop.f32.mrb[22].mxu0 }
 0x665   : > { %1293 = vrot.lane.b32.xlu1 %v1626_v33, %s2429_s30  ;;  %v1726_v36 = vpop.f32.mrb[23].mxu0  ;;  %s2230_s30 = scalar_lea.vmem %s2229_s0, 256 }
 0x666   : > { %p2232_p1 = scmp.lt.s32.totalorder %s2230_s30, %s2224_s9 }
 0x668   : > { %p2233_p11 = por %p2232_p1, %p2231_p10 }
 0x66a   : > { %p2234_p12 = pnand %p2233_p11, %p2227_p0 }
 0x6c6   : > { %v1054_v37 = vpop.permute.xlu1 %1053 }
 0x6c7   : > { %1057 = vst.msk [vmem:[#allocation2] sm:$0xf] %vm1056_vm11, %v1054_v37 }
 0x6cf   : > { %v1174_v38 = vpop.permute.xlu0 %1173 }
 0x6d0   : > { %1177 = vst.msk [vmem:[#allocation2] sm:$0xf] %vm1176_vm12, %v1174_v38 }
 0x6d7   : > { %v1294_v0 = vpop.permute.xlu1 %1293 }
 0x6d8   : > { %1297 = vst.msk [vmem:[#allocation2] sm:$0xf] %vm1296_vm13, %v1294_v0 }
 0x6df   : > { %v1298_v39 = vld [vmem:[#allocation2] sm:$0xf] }
 0x6e0   : > { %1732 = vmatmul.mubr.msk.bf16.vlgmr.msra.gmra.mrb[20].mxu1 %vm585_vm1, %v1298_v39 }
 0x7b3   : > { %v1348_v40 = vpop.f32.mrb[20].mxu1 }
 0x7b4   : > { %1354 = vst.msk [vmem:[%s550_s28] sm:$0xff] %vm585_vm1, %v1348_v40  ;;  %v1733_v41 = vpop.f32.mrb[21].mxu1 }
 0x7b5   : > { %v1351_v42 = vpop.f32.mrb[22].mxu1 }
 0x7b6   : > { %2237 = shalt.err (!%p2234_p12)
}
 0x7b7   : > { %s2238_s11 = scalar_lea.hbm %s3284_s19, 128  ;;  %s2242_s3 = scalar_lea.hbm %s3525_s5, 256 }
 0x7b8   : > { %p2239_p5 = scmp.ne.s32.totalorder %s3284_s19, %s2238_s11  ;;  %p2243_p6 = scmp.lt.u32.totalorder %s3284_s19, %s3525_s5 }
 0x7b9   : > { %p2244_p7 = scmp.lt.u32.totalorder %s2242_s3, %s2238_s11  ;;  %p2246_p8 = scmp.lt.u32.totalorder %s2238_s11, %s3284_s19 }
 0x7ba   : > { %p2240_p3 = pnand %p2239_p5, %p3526_p13 }
 0x7bb   : > { %p2245_p2 = por %p2244_p7, %p2243_p6 }
 0x7bc   : > { %p2241_p4 = pneg %p2240_p3 }
 0x7bd   : > { %p2247_p9 = por %p2246_p8, %p2245_p2 }
 0x7bf   : > { %p2248_p0 = pnand %p2247_p9, %p2241_p4 }
 0x7c1   : > { %2251 = shalt.err (!%p2248_p0)
}
 0x7c2   : > { %1763 = dma.vmem_to_hbm [thread:$0]  (%p3526_p13), %s3286_s21, 128, %s3284_s19, %s1356_s29   ;;  %v1734_v22 = vpop.f32.mrb[23].mxu1 }
 0x7c3 PF: > { %s3527_s17 = sld [smem:[#allocation44_spill]]  ;;  %s3528_s6 = sld [smem:[#allocation52_spill]] }
 0x7c4   : > { %p3530_p1 = scmp.ge.s32.totalorder %s2412_s12, 2 }
 0x7c9   : > { %s1381_s13 = sand.u32 1, %s3527_s17   ;;  %p3529_p10 = scmp.ne.s32.totalorder %s3528_s6, 0 }
 0x7ca   : > { %s1382_s26 = scalar_lea.sflag [#allocation7], %s1381_s13 }
 0x7cb   : > { %p1800_p11 = pnand %p3530_p1, %p3529_p10 }
 0x7cd   : > { %2347 = dma.done.wait (!%p1800_p11), %s1382_s26, 128  }
 0x7ce   : > { %2349 = vsyncadd (!%p1800_p11), %s1382_s26, 4294967168  ;;  %s3531_s19 = sld [smem:[#allocation38_spill]]  ;;  %s3532_s20 = sld [smem:[#allocation39_spill]] }
 0x7cf   : > { %s3533_s7 = sld [smem:[#allocation40_spill]]  ;;  %s3534_s23 = sld [smem:[#allocation49_spill]] }
 0x7d0   : > { %s3535_s28 = sld [smem:[#allocation41_spill]]  ;;  %s3536_s26 = sld [smem:[#allocation54_spill]] }
 0x7d1   : > { %s3537_s27 = sld [smem:[#allocation42_spill]]  ;;  %s3538_s14 = sld [smem:[#allocation43_spill]] }
 0x7d2   : > { %s3539_s29 = sld [smem:[#allocation48_spill]]  ;;  %s3540_s9 = sld [smem:[#allocation45_spill]] }
 0x7d3   : > { %s3541_s11 = sld [smem:[#allocation50_spill]]  ;;  %p36_p13 = scmp.ge.s32.totalorder %s2600_s18, 4  }
 0x7d4   : > { %s3542_s21 = smov %s3564_s24  ;;  %s3543_s0 = smov %s2368_s22 }
 0x7d5   : > { %s3544_s22 = smov %s3533_s7  ;;  %s3545_s24 = smov %s2380_s25 }
 0x7d6   : > { %s3546_s25 = smov %s3535_s28  ;;  %s3548_s30 = smov %s2404_s10 }
 0x7d7   : > { %s3547_s28 = smov %s3538_s14  ;;  %s3550_s12 = smov %s2600_s18 }
 0x7d8   : > { %s3549_s10 = smov %s3540_s9  ;;  %38 = sbr.rel (!%p36_p13) target bundleno = 34 (0x22), region = 166 }
 0x7df   :  { %1387 = vsyncpa [#allocation6], 1 }
 0x7e0   :  { %1389 = vsyncpa [#allocation6 + $0x1], 1 }
 0x7e1   :  { %1390 = vsyncpa [#allocation9], 1 }
 0x7e2   :  { %1392 = vsyncpa [#allocation9 + $0x1], 1 }
 0x7e3   :  { %1393 = vsyncpa [#allocation12], 1 }
 0x7e4   :  { %1395 = vsyncpa [#allocation12 + $0x1], 1 }
 0x7e5   :  { %1396 = vsyncpa [#allocation15], 1 }
 0x7e6   :  { %1397 = vsyncpa [#allocation18], 1 }
 0x7e7   :  { %1399 = vsyncpa [#allocation18 + $0x1], 1 }
 0x7e8   :  { %1400 = vsyncpa [#allocation7], 1 }
 0x7e9   :  { %1402 = vsyncpa [#allocation7 + $0x1], 1 }

</bundles_post_ra>
